<compile_context>
chip_gen: v7x
topology: tpu7x:2x2x1
jax: 0.10.0
libtpu: 0.0.40
codegen_flags: <defaults>
</compile_context>

<pallas_src>
import functools

import numpy as np
import jax
import jax.numpy as jnp
from jax.experimental import pallas as pl
from jax.experimental.pallas import tpu as pltpu


# ----------------------------------------------------------------------------
# Kernels
# ----------------------------------------------------------------------------

def _conv_sig_pool_kernel(x_ref, t_ref, b_ref, ph_ref, pw_ref, o_ref, *,
                          num_taps, ho):
    # x_ref : (1, H, W*Cin)        f32   one image as a 2-D slab
    # t_ref : (K, W*Cin, Wo*Cout)  bf16  block-Toeplitz conv weight (resident)
    # b_ref : (1, Wo*Cout)         f32   bias tiled over Wo
    # ph/pw : pooling matrices (Hp, Ho) / (Wo*Cout, Wp*Cout), 0.25 folded in ph
    # o_ref : (1, Hp, Wp*Cout)     f32   pooled, sigmoid'd activation slab
    x = x_ref[0]                                            # (H, W*Cin)
    acc = jnp.dot(x[0:ho, :].astype(jnp.bfloat16), t_ref[0],
                  preferred_element_type=jnp.float32)
    for kh in range(1, num_taps):
        acc = acc + jnp.dot(x[kh:kh + ho, :].astype(jnp.bfloat16), t_ref[kh],
                            preferred_element_type=jnp.float32)
    y = jax.nn.sigmoid(acc + b_ref[...])                    # (Ho, Wo*Cout)
    # fused 2x2 average pool as two small matmuls (stays in VMEM)
    z = jnp.dot(jnp.dot(ph_ref[...], y, preferred_element_type=jnp.float32),
                pw_ref[...], preferred_element_type=jnp.float32)
    o_ref[0] = z.astype(o_ref.dtype)                        # (Hp, Wp*Cout)


def _tail_kernel(x_ref, w5_ref, b5_ref, w1_ref, b1_ref, w2_ref, b2_ref, o_ref):
    # Fused c5 (conv-as-linear) -> sigmoid -> fc1 -> sigmoid -> fc2.
    h = jnp.dot(x_ref[...].astype(jnp.bfloat16), w5_ref[...],
                preferred_element_type=jnp.float32) + b5_ref[...]
    h = jax.nn.sigmoid(h)
    h = jnp.dot(h.astype(jnp.bfloat16), w1_ref[...],
                preferred_element_type=jnp.float32) + b1_ref[...]
    h = jax.nn.sigmoid(h)
    o = jnp.dot(h.astype(jnp.bfloat16), w2_ref[...],
                preferred_element_type=jnp.float32) + b2_ref[...]
    o_ref[...] = o.astype(o_ref.dtype)


# ----------------------------------------------------------------------------
# Pallas wrappers
# ----------------------------------------------------------------------------

def conv_sig_pool(x, t, bias_row, ph, pw):
    # x: (B, H, W*Cin) f32 slab; returns (B, Hp, Wp*Cout) f32 slab.
    B, H, WC = x.shape
    K = t.shape[0]
    Hp, Ho = ph.shape
    WpCout = pw.shape[1]
    kern = functools.partial(_conv_sig_pool_kernel, num_taps=K, ho=Ho)
    return pl.pallas_call(
        kern,
        out_shape=jax.ShapeDtypeStruct((B, Hp, WpCout), jnp.float32),
        grid_spec=pltpu.PrefetchScalarGridSpec(
            num_scalar_prefetch=0,
            grid=(B,),
            in_specs=[
                pl.BlockSpec((1, H, WC), lambda b: (b, 0, 0)),
                pl.BlockSpec(t.shape, lambda b: (0, 0, 0)),        # resident
                pl.BlockSpec(bias_row.shape, lambda b: (0, 0)),    # resident
                pl.BlockSpec(ph.shape, lambda b: (0, 0)),          # resident
                pl.BlockSpec(pw.shape, lambda b: (0, 0)),          # resident
            ],
            out_specs=pl.BlockSpec((1, Hp, WpCout), lambda b: (b, 0, 0)),
        ),
        compiler_params=pltpu.CompilerParams(
            dimension_semantics=("parallel",)),
    )(x, t, bias_row, ph, pw)


def fused_tail(x, w5, b5, w1, b1, w2, b2):
    # x: (B, 400) f32 -> logits (B, num_classes) f32.
    B, Din = x.shape
    nc = w2.shape[1]
    tb = B if B <= 512 else 512
    return pl.pallas_call(
        _tail_kernel,
        out_shape=jax.ShapeDtypeStruct((B, nc), jnp.float32),
        grid_spec=pltpu.PrefetchScalarGridSpec(
            num_scalar_prefetch=0,
            grid=(pl.cdiv(B, tb),),
            in_specs=[
                pl.BlockSpec((tb, Din), lambda i: (i, 0)),
                pl.BlockSpec(w5.shape, lambda i: (0, 0)),
                pl.BlockSpec(b5.shape, lambda i: (0, 0)),
                pl.BlockSpec(w1.shape, lambda i: (0, 0)),
                pl.BlockSpec(b1.shape, lambda i: (0, 0)),
                pl.BlockSpec(w2.shape, lambda i: (0, 0)),
                pl.BlockSpec(b2.shape, lambda i: (0, 0)),
            ],
            out_specs=pl.BlockSpec((tb, nc), lambda i: (i, 0)),
        ),
        compiler_params=pltpu.CompilerParams(
            dimension_semantics=("parallel",)),
    )(x, w5, b5, w1, b1, w2, b2)


# ----------------------------------------------------------------------------
# Parameter construction (PyTorch layout) + one-time kernel-layout preparation
# ----------------------------------------------------------------------------

def init_lenet_params(key, in_channel, num_classes):
    ks = jax.random.split(key, 10)

    def w(k, shape, scale=0.1):
        return scale * jax.random.normal(k, shape, dtype=jnp.float32)

    return {
        "c1_w": w(ks[0], (6, in_channel, 5, 5)),
        "c1_b": w(ks[1], (6,)),
        "c3_w": w(ks[2], (16, 6, 5, 5)),
        "c3_b": w(ks[3], (16,)),
        "c5_w": w(ks[4], (120, 16, 5, 5)),
        "c5_b": w(ks[5], (120,)),
        "fc1_w": w(ks[6], (84, 120)),      # PyTorch Linear: (out, in)
        "fc1_b": w(ks[7], (84,)),
        "fc2_w": w(ks[8], (num_classes, 84)),
        "fc2_b": w(ks[9], (num_classes,)),
    }


def _toeplitz_conv_weight(w_oihw, w_in):
    # (Cout, Cin, K, K) -> block-Toeplitz (K, W_in*Cin, Wo*Cout), bf16.
    w = np.asarray(w_oihw, dtype=np.float32)
    cout, cin, k, _ = w.shape
    wo = w_in - k + 1
    wt = np.transpose(w, (2, 3, 1, 0))               # (kh, kw, cin, cout)
    t = np.zeros((k, w_in, cin, wo, cout), np.float32)
    for j in range(wo):
        t[:, j:j + k, :, j, :] += wt
    return jnp.asarray(t.reshape(k, w_in * cin, wo * cout), dtype=jnp.bfloat16)


def _pool_matrices(ho, wo, cout):
    hp, wp = ho // 2, wo // 2
    ph = np.zeros((hp, ho), np.float32)
    ph[np.arange(ho) // 2, np.arange(ho)] = 0.25      # 1/4 folded here
    pw = np.zeros((wo * cout, wp * cout), np.float32)
    for j in range(wo):
        for c in range(cout):
            pw[j * cout + c, (j // 2) * cout + c] = 1.0
    return jnp.asarray(ph), jnp.asarray(pw)


def _conv_bias_row(b, wo):
    return jnp.asarray(np.tile(np.asarray(b, np.float32), wo)[None, :])


def prepare_kernel_params(params, in_hw):
    """One-time weight re-layout (pre-transpose / Toeplitz / bf16)."""
    H, W = in_hw
    K = 5
    kp = {}
    # stage 1: c1 + sigmoid + s2
    cout1 = params["c1_w"].shape[0]
    Ho1, Wo1 = H - K + 1, W - K + 1
    kp["t1"] = _toeplitz_conv_weight(params["c1_w"], W)
    kp["bias1"] = _conv_bias_row(params["c1_b"], Wo1)
    kp["ph1"], kp["pw1"] = _pool_matrices(Ho1, Wo1, cout1)
    H2, W2 = Ho1 // 2, Wo1 // 2
    # stage 2: c3 + sigmoid + s4
    cout3 = params["c3_w"].shape[0]
    Ho3, Wo3 = H2 - K + 1, W2 - K + 1
    kp["t3"] = _toeplitz_conv_weight(params["c3_w"], W2)
    kp["bias3"] = _conv_bias_row(params["c3_b"], Wo3)
    kp["ph3"], kp["pw3"] = _pool_matrices(Ho3, Wo3, cout3)
    H4, W4 = Ho3 // 2, Wo3 // 2
    assert H4 == 5 and W4 == 5, "c5 (5x5 conv) needs a 5x5 input (use 32x32 images)"
    # tail: c5 as linear over (h, w, c)-flattened features, then fc1, fc2
    c5 = np.asarray(params["c5_w"], np.float32)       # (120, 16, 5, 5)
    kp["w5"] = jnp.asarray(
        np.transpose(c5, (2, 3, 1, 0)).reshape(K * K * c5.shape[1], c5.shape[0]),
        dtype=jnp.bfloat16)
    kp["b5"] = jnp.asarray(np.asarray(params["c5_b"], np.float32)[None, :])
    kp["wf1"] = jnp.asarray(np.asarray(params["fc1_w"], np.float32).T, jnp.bfloat16)
    kp["bf1"] = jnp.asarray(np.asarray(params["fc1_b"], np.float32)[None, :])
    kp["wf2"] = jnp.asarray(np.asarray(params["fc2_w"], np.float32).T, jnp.bfloat16)
    kp["bf2"] = jnp.asarray(np.asarray(params["fc2_b"], np.float32)[None, :])
    return kp


# ----------------------------------------------------------------------------
# Forward
# ----------------------------------------------------------------------------

def lenet_forward(kp, x_nchw):
    B, Cin, H, W = x_nchw.shape
    # PyTorch NCHW -> lane-dense NHWC slab (B, H, W*Cin); layout glue only.
    x = jnp.transpose(x_nchw, (0, 2, 3, 1)).astype(jnp.float32).reshape(B, H, W * Cin)
    x = conv_sig_pool(x, kp["t1"], kp["bias1"], kp["ph1"], kp["pw1"])   # (B,14,14*6)
    x = conv_sig_pool(x, kp["t3"], kp["bias3"], kp["ph3"], kp["pw3"])   # (B, 5, 5*16)
    x = x.reshape(B, x.shape[1] * x.shape[2])                           # (B, 400), (h,w,c) order
    return fused_tail(x, kp["w5"], kp["b5"], kp["wf1"], kp["bf1"],
                      kp["wf2"], kp["bf2"])                              # (B, num_classes)


if __name__ == "__main__":
    key = jax.random.PRNGKey(0)
    k_x, k_p = jax.random.split(key)
    in_channel, num_classes = 1, 10
    # LeNet's conv stack implies 32x32 spatial input (c5 reduces 5x5 -> 1x1).
    x = jax.random.normal(k_x, (2, in_channel, 32, 32), dtype=jnp.float32)
    raw_params = init_lenet_params(k_p, in_channel, num_classes)
    kparams = prepare_kernel_params(raw_params, (32, 32))

    out = jax.jit(lenet_forward)(kparams, x)
    out = jax.block_until_ready(out)
    assert out.shape == (2, num_classes) and out.dtype == jnp.float32
    print("KERNEL_OK")
</pallas_src>

<mosaic_0001>
module attributes {stable_mosaic.version = 11 : i64} {
  func.func @_conv_sig_pool_kernel(%arg0: i32, %arg1: memref<1x14x84xf32, #tpu.memory_space<vmem>>, %arg2: memref<5x84x160xbf16, #tpu.memory_space<vmem>>, %arg3: memref<1x160xf32, #tpu.memory_space<vmem>>, %arg4: memref<5x10xf32, #tpu.memory_space<vmem>>, %arg5: memref<160x80xf32, #tpu.memory_space<vmem>>, %arg6: memref<1x5x80xf32, #tpu.memory_space<vmem>>) attributes {dimension_semantics = [#tpu.dimension_semantics<parallel>], iteration_bounds = array<i64: 2>, scalar_prefetch = 0 : i64, scratch_operands = 0 : i64, tpu.core_type = #tpu.core_type<tc>, window_params = [{transform_indices = @transform_0, window_bounds = array<i64: 1, 14, 84>}, {pipeline_mode = #tpu.pipeline_mode<synchronous>, transform_indices = @transform_1, window_bounds = array<i64: 5, 84, 160>}, {pipeline_mode = #tpu.pipeline_mode<synchronous>, transform_indices = @transform_2, window_bounds = array<i64: 1, 160>}, {pipeline_mode = #tpu.pipeline_mode<synchronous>, transform_indices = @transform_3, window_bounds = array<i64: 5, 10>}, {pipeline_mode = #tpu.pipeline_mode<synchronous>, transform_indices = @transform_4, window_bounds = array<i64: 160, 80>}, {transform_indices = @transform_5, window_bounds = array<i64: 1, 5, 80>}]} {
    %c0 = arith.constant 0 : index
    %c0_0 = arith.constant 0 : index
    %c0_1 = arith.constant 0 : index
    %0 = vector.load %arg1[%c0, %c0_0, %c0_1] : memref<1x14x84xf32, #tpu.memory_space<vmem>>, vector<1x14x84xf32>
    %1 = vector.shape_cast %0 : vector<1x14x84xf32> to vector<14x84xf32>
    %2 = vector.extract_strided_slice %1 {offsets = [0, 0], sizes = [10, 84], strides = [1, 1]} : vector<14x84xf32> to vector<10x84xf32>
    %3 = arith.truncf %2 : vector<10x84xf32> to vector<10x84xbf16>
    %c0_2 = arith.constant 0 : index
    %c0_3 = arith.constant 0 : index
    %c0_4 = arith.constant 0 : index
    %4 = vector.load %arg2[%c0_2, %c0_3, %c0_4] : memref<5x84x160xbf16, #tpu.memory_space<vmem>>, vector<1x84x160xbf16>
    %5 = vector.shape_cast %4 : vector<1x84x160xbf16> to vector<84x160xbf16>
    %cst = arith.constant dense<0.000000e+00> : vector<10x160xf32>
    %6 = tpu.matmul %3, %5, %cst {dimension_numbers = #tpu.dot_dimension_numbers<[1], [0], [0], [1], [0, 0, 1, 1], [], []>} : vector<10x84xbf16>, vector<84x160xbf16>, vector<10x160xf32> -> vector<10x160xf32>
    %7 = vector.extract_strided_slice %1 {offsets = [1, 0], sizes = [10, 84], strides = [1, 1]} : vector<14x84xf32> to vector<10x84xf32>
    %8 = arith.truncf %7 : vector<10x84xf32> to vector<10x84xbf16>
    %c1 = arith.constant 1 : index
    %c0_5 = arith.constant 0 : index
    %c0_6 = arith.constant 0 : index
    %9 = vector.load %arg2[%c1, %c0_5, %c0_6] : memref<5x84x160xbf16, #tpu.memory_space<vmem>>, vector<1x84x160xbf16>
    %10 = vector.shape_cast %9 : vector<1x84x160xbf16> to vector<84x160xbf16>
    %cst_7 = arith.constant dense<0.000000e+00> : vector<10x160xf32>
    %11 = tpu.matmul %8, %10, %cst_7 {dimension_numbers = #tpu.dot_dimension_numbers<[1], [0], [0], [1], [0, 0, 1, 1], [], []>} : vector<10x84xbf16>, vector<84x160xbf16>, vector<10x160xf32> -> vector<10x160xf32>
    %12 = arith.addf %6, %11 : vector<10x160xf32>
    %13 = vector.extract_strided_slice %1 {offsets = [2, 0], sizes = [10, 84], strides = [1, 1]} : vector<14x84xf32> to vector<10x84xf32>
    %14 = arith.truncf %13 : vector<10x84xf32> to vector<10x84xbf16>
    %c2 = arith.constant 2 : index
    %c0_8 = arith.constant 0 : index
    %c0_9 = arith.constant 0 : index
    %15 = vector.load %arg2[%c2, %c0_8, %c0_9] : memref<5x84x160xbf16, #tpu.memory_space<vmem>>, vector<1x84x160xbf16>
    %16 = vector.shape_cast %15 : vector<1x84x160xbf16> to vector<84x160xbf16>
    %cst_10 = arith.constant dense<0.000000e+00> : vector<10x160xf32>
    %17 = tpu.matmul %14, %16, %cst_10 {dimension_numbers = #tpu.dot_dimension_numbers<[1], [0], [0], [1], [0, 0, 1, 1], [], []>} : vector<10x84xbf16>, vector<84x160xbf16>, vector<10x160xf32> -> vector<10x160xf32>
    %18 = arith.addf %12, %17 : vector<10x160xf32>
    %19 = vector.extract_strided_slice %1 {offsets = [3, 0], sizes = [10, 84], strides = [1, 1]} : vector<14x84xf32> to vector<10x84xf32>
    %20 = arith.truncf %19 : vector<10x84xf32> to vector<10x84xbf16>
    %c3 = arith.constant 3 : index
    %c0_11 = arith.constant 0 : index
    %c0_12 = arith.constant 0 : index
    %21 = vector.load %arg2[%c3, %c0_11, %c0_12] : memref<5x84x160xbf16, #tpu.memory_space<vmem>>, vector<1x84x160xbf16>
    %22 = vector.shape_cast %21 : vector<1x84x160xbf16> to vector<84x160xbf16>
    %cst_13 = arith.constant dense<0.000000e+00> : vector<10x160xf32>
    %23 = tpu.matmul %20, %22, %cst_13 {dimension_numbers = #tpu.dot_dimension_numbers<[1], [0], [0], [1], [0, 0, 1, 1], [], []>} : vector<10x84xbf16>, vector<84x160xbf16>, vector<10x160xf32> -> vector<10x160xf32>
    %24 = arith.addf %18, %23 : vector<10x160xf32>
    %25 = vector.extract_strided_slice %1 {offsets = [4, 0], sizes = [10, 84], strides = [1, 1]} : vector<14x84xf32> to vector<10x84xf32>
    %26 = arith.truncf %25 : vector<10x84xf32> to vector<10x84xbf16>
    %c4 = arith.constant 4 : index
    %c0_14 = arith.constant 0 : index
    %c0_15 = arith.constant 0 : index
    %27 = vector.load %arg2[%c4, %c0_14, %c0_15] : memref<5x84x160xbf16, #tpu.memory_space<vmem>>, vector<1x84x160xbf16>
    %28 = vector.shape_cast %27 : vector<1x84x160xbf16> to vector<84x160xbf16>
    %cst_16 = arith.constant dense<0.000000e+00> : vector<10x160xf32>
    %29 = tpu.matmul %26, %28, %cst_16 {dimension_numbers = #tpu.dot_dimension_numbers<[1], [0], [0], [1], [0, 0, 1, 1], [], []>} : vector<10x84xbf16>, vector<84x160xbf16>, vector<10x160xf32> -> vector<10x160xf32>
    %30 = arith.addf %24, %29 : vector<10x160xf32>
    %c0_17 = arith.constant 0 : index
    %c0_18 = arith.constant 0 : index
    %31 = vector.load %arg3[%c0_17, %c0_18] : memref<1x160xf32, #tpu.memory_space<vmem>>, vector<1x160xf32>
    %32 = vector.broadcast %31 : vector<1x160xf32> to vector<10x160xf32>
    %33 = arith.addf %30, %32 : vector<10x160xf32>
    %34 = arith.negf %33 : vector<10x160xf32>
    %35 = math.exp %34 : vector<10x160xf32>
    %cst_19 = arith.constant 1.000000e+00 : f32
    %36 = vector.broadcast %cst_19 : f32 to vector<10x160xf32>
    %37 = arith.addf %36, %35 : vector<10x160xf32>
    %38 = arith.divf %36, %37 : vector<10x160xf32>
    %c0_20 = arith.constant 0 : index
    %c0_21 = arith.constant 0 : index
    %39 = vector.load %arg4[%c0_20, %c0_21] : memref<5x10xf32, #tpu.memory_space<vmem>>, vector<5x10xf32>
    %cst_22 = arith.constant dense<0.000000e+00> : vector<5x160xf32>
    %40 = tpu.matmul %39, %38, %cst_22 {dimension_numbers = #tpu.dot_dimension_numbers<[1], [0], [0], [1], [0, 0, 1, 1], [], []>} : vector<5x10xf32>, vector<10x160xf32>, vector<5x160xf32> -> vector<5x160xf32>
    %c0_23 = arith.constant 0 : index
    %c0_24 = arith.constant 0 : index
    %41 = vector.load %arg5[%c0_23, %c0_24] : memref<160x80xf32, #tpu.memory_space<vmem>>, vector<160x80xf32>
    %cst_25 = arith.constant dense<0.000000e+00> : vector<5x80xf32>
    %42 = tpu.matmul %40, %41, %cst_25 {dimension_numbers = #tpu.dot_dimension_numbers<[1], [0], [0], [1], [0, 0, 1, 1], [], []>} : vector<5x160xf32>, vector<160x80xf32>, vector<5x80xf32> -> vector<5x80xf32>
    %c0_26 = arith.constant 0 : index
    %c0_27 = arith.constant 0 : index
    %c0_28 = arith.constant 0 : index
    %43 = vector.load %arg6[%c0_26, %c0_27, %c0_28] : memref<1x5x80xf32, #tpu.memory_space<vmem>>, vector<1x5x80xf32>
    %44 = vector.shape_cast %43 : vector<1x5x80xf32> to vector<5x80xf32>
    %45 = vector.shape_cast %42 : vector<5x80xf32> to vector<1x5x80xf32>
    tpu.vector_store %arg6[%c0_26, %c0_27, %c0_28], %45 {strides = array<i32>} : memref<1x5x80xf32, #tpu.memory_space<vmem>>, vector<1x5x80xf32>,
    return
  }
  func.func @transform_0(%arg0: i32) -> (i32, i32, i32) {
    %c0_i32 = arith.constant 0 : i32
    %c0_i32_0 = arith.constant 0 : i32
    %c0_i32_1 = arith.constant 0 : i32
    return %arg0, %c0_i32, %c0_i32_0 : i32, i32, i32
  }
  func.func @transform_1(%arg0: i32) -> (i32, i32, i32) {
    %c0_i32 = arith.constant 0 : i32
    %c0_i32_0 = arith.constant 0 : i32
    %c0_i32_1 = arith.constant 0 : i32
    %c0_i32_2 = arith.constant 0 : i32
    return %c0_i32, %c0_i32_0, %c0_i32_1 : i32, i32, i32
  }
  func.func @transform_2(%arg0: i32) -> (i32, i32) {
    %c0_i32 = arith.constant 0 : i32
    %c0_i32_0 = arith.constant 0 : i32
    %c0_i32_1 = arith.constant 0 : i32
    return %c0_i32, %c0_i32_0 : i32, i32
  }
  func.func @transform_3(%arg0: i32) -> (i32, i32) {
    %c0_i32 = arith.constant 0 : i32
    %c0_i32_0 = arith.constant 0 : i32
    %c0_i32_1 = arith.constant 0 : i32
    return %c0_i32, %c0_i32_0 : i32, i32
  }
  func.func @transform_4(%arg0: i32) -> (i32, i32) {
    %c0_i32 = arith.constant 0 : i32
    %c0_i32_0 = arith.constant 0 : i32
    %c0_i32_1 = arith.constant 0 : i32
    return %c0_i32, %c0_i32_0 : i32, i32
  }
  func.func @transform_5(%arg0: i32) -> (i32, i32, i32) {
    %c0_i32 = arith.constant 0 : i32
    %c0_i32_0 = arith.constant 0 : i32
    %c0_i32_1 = arith.constant 0 : i32
    return %arg0, %c0_i32, %c0_i32_0 : i32, i32, i32
  }
}

module attributes {stable_mosaic.version = 11 : i64} {
  func.func @_conv_sig_pool_kernel(%arg0: i32, %arg1: memref<1x32x32xf32, #tpu.memory_space<vmem>>, %arg2: memref<5x32x168xbf16, #tpu.memory_space<vmem>>, %arg3: memref<1x168xf32, #tpu.memory_space<vmem>>, %arg4: memref<14x28xf32, #tpu.memory_space<vmem>>, %arg5: memref<168x84xf32, #tpu.memory_space<vmem>>, %arg6: memref<1x14x84xf32, #tpu.memory_space<vmem>>) attributes {dimension_semantics = [#tpu.dimension_semantics<parallel>], iteration_bounds = array<i64: 2>, scalar_prefetch = 0 : i64, scratch_operands = 0 : i64, tpu.core_type = #tpu.core_type<tc>, window_params = [{transform_indices = @transform_0, window_bounds = array<i64: 1, 32, 32>}, {pipeline_mode = #tpu.pipeline_mode<synchronous>, transform_indices = @transform_1, window_bounds = array<i64: 5, 32, 168>}, {pipeline_mode = #tpu.pipeline_mode<synchronous>, transform_indices = @transform_2, window_bounds = array<i64: 1, 168>}, {pipeline_mode = #tpu.pipeline_mode<synchronous>, transform_indices = @transform_3, window_bounds = array<i64: 14, 28>}, {pipeline_mode = #tpu.pipeline_mode<synchronous>, transform_indices = @transform_4, window_bounds = array<i64: 168, 84>}, {transform_indices = @transform_5, window_bounds = array<i64: 1, 14, 84>}]} {
    %c0 = arith.constant 0 : index
    %c0_0 = arith.constant 0 : index
    %c0_1 = arith.constant 0 : index
    %0 = vector.load %arg1[%c0, %c0_0, %c0_1] : memref<1x32x32xf32, #tpu.memory_space<vmem>>, vector<1x32x32xf32>
    %1 = vector.shape_cast %0 : vector<1x32x32xf32> to vector<32x32xf32>
    %2 = vector.extract_strided_slice %1 {offsets = [0, 0], sizes = [28, 32], strides = [1, 1]} : vector<32x32xf32> to vector<28x32xf32>
    %3 = arith.truncf %2 : vector<28x32xf32> to vector<28x32xbf16>
    %c0_2 = arith.constant 0 : index
    %c0_3 = arith.constant 0 : index
    %c0_4 = arith.constant 0 : index
    %4 = vector.load %arg2[%c0_2, %c0_3, %c0_4] : memref<5x32x168xbf16, #tpu.memory_space<vmem>>, vector<1x32x168xbf16>
    %5 = vector.shape_cast %4 : vector<1x32x168xbf16> to vector<32x168xbf16>
    %cst = arith.constant dense<0.000000e+00> : vector<28x168xf32>
    %6 = tpu.matmul %3, %5, %cst {dimension_numbers = #tpu.dot_dimension_numbers<[1], [0], [0], [1], [0, 0, 1, 1], [], []>} : vector<28x32xbf16>, vector<32x168xbf16>, vector<28x168xf32> -> vector<28x168xf32>
    %7 = vector.extract_strided_slice %1 {offsets = [1, 0], sizes = [28, 32], strides = [1, 1]} : vector<32x32xf32> to vector<28x32xf32>
    %8 = arith.truncf %7 : vector<28x32xf32> to vector<28x32xbf16>
    %c1 = arith.constant 1 : index
    %c0_5 = arith.constant 0 : index
    %c0_6 = arith.constant 0 : index
    %9 = vector.load %arg2[%c1, %c0_5, %c0_6] : memref<5x32x168xbf16, #tpu.memory_space<vmem>>, vector<1x32x168xbf16>
    %10 = vector.shape_cast %9 : vector<1x32x168xbf16> to vector<32x168xbf16>
    %cst_7 = arith.constant dense<0.000000e+00> : vector<28x168xf32>
    %11 = tpu.matmul %8, %10, %cst_7 {dimension_numbers = #tpu.dot_dimension_numbers<[1], [0], [0], [1], [0, 0, 1, 1], [], []>} : vector<28x32xbf16>, vector<32x168xbf16>, vector<28x168xf32> -> vector<28x168xf32>
    %12 = arith.addf %6, %11 : vector<28x168xf32>
    %13 = vector.extract_strided_slice %1 {offsets = [2, 0], sizes = [28, 32], strides = [1, 1]} : vector<32x32xf32> to vector<28x32xf32>
    %14 = arith.truncf %13 : vector<28x32xf32> to vector<28x32xbf16>
    %c2 = arith.constant 2 : index
    %c0_8 = arith.constant 0 : index
    %c0_9 = arith.constant 0 : index
    %15 = vector.load %arg2[%c2, %c0_8, %c0_9] : memref<5x32x168xbf16, #tpu.memory_space<vmem>>, vector<1x32x168xbf16>
    %16 = vector.shape_cast %15 : vector<1x32x168xbf16> to vector<32x168xbf16>
    %cst_10 = arith.constant dense<0.000000e+00> : vector<28x168xf32>
    %17 = tpu.matmul %14, %16, %cst_10 {dimension_numbers = #tpu.dot_dimension_numbers<[1], [0], [0], [1], [0, 0, 1, 1], [], []>} : vector<28x32xbf16>, vector<32x168xbf16>, vector<28x168xf32> -> vector<28x168xf32>
    %18 = arith.addf %12, %17 : vector<28x168xf32>
    %19 = vector.extract_strided_slice %1 {offsets = [3, 0], sizes = [28, 32], strides = [1, 1]} : vector<32x32xf32> to vector<28x32xf32>
    %20 = arith.truncf %19 : vector<28x32xf32> to vector<28x32xbf16>
    %c3 = arith.constant 3 : index
    %c0_11 = arith.constant 0 : index
    %c0_12 = arith.constant 0 : index
    %21 = vector.load %arg2[%c3, %c0_11, %c0_12] : memref<5x32x168xbf16, #tpu.memory_space<vmem>>, vector<1x32x168xbf16>
    %22 = vector.shape_cast %21 : vector<1x32x168xbf16> to vector<32x168xbf16>
    %cst_13 = arith.constant dense<0.000000e+00> : vector<28x168xf32>
    %23 = tpu.matmul %20, %22, %cst_13 {dimension_numbers = #tpu.dot_dimension_numbers<[1], [0], [0], [1], [0, 0, 1, 1], [], []>} : vector<28x32xbf16>, vector<32x168xbf16>, vector<28x168xf32> -> vector<28x168xf32>
    %24 = arith.addf %18, %23 : vector<28x168xf32>
    %25 = vector.extract_strided_slice %1 {offsets = [4, 0], sizes = [28, 32], strides = [1, 1]} : vector<32x32xf32> to vector<28x32xf32>
    %26 = arith.truncf %25 : vector<28x32xf32> to vector<28x32xbf16>
    %c4 = arith.constant 4 : index
    %c0_14 = arith.constant 0 : index
    %c0_15 = arith.constant 0 : index
    %27 = vector.load %arg2[%c4, %c0_14, %c0_15] : memref<5x32x168xbf16, #tpu.memory_space<vmem>>, vector<1x32x168xbf16>
    %28 = vector.shape_cast %27 : vector<1x32x168xbf16> to vector<32x168xbf16>
    %cst_16 = arith.constant dense<0.000000e+00> : vector<28x168xf32>
    %29 = tpu.matmul %26, %28, %cst_16 {dimension_numbers = #tpu.dot_dimension_numbers<[1], [0], [0], [1], [0, 0, 1, 1], [], []>} : vector<28x32xbf16>, vector<32x168xbf16>, vector<28x168xf32> -> vector<28x168xf32>
    %30 = arith.addf %24, %29 : vector<28x168xf32>
    %c0_17 = arith.constant 0 : index
    %c0_18 = arith.constant 0 : index
    %31 = vector.load %arg3[%c0_17, %c0_18] : memref<1x168xf32, #tpu.memory_space<vmem>>, vector<1x168xf32>
    %32 = vector.broadcast %31 : vector<1x168xf32> to vector<28x168xf32>
    %33 = arith.addf %30, %32 : vector<28x168xf32>
    %34 = arith.negf %33 : vector<28x168xf32>
    %35 = math.exp %34 : vector<28x168xf32>
    %cst_19 = arith.constant 1.000000e+00 : f32
    %36 = vector.broadcast %cst_19 : f32 to vector<28x168xf32>
    %37 = arith.addf %36, %35 : vector<28x168xf32>
    %38 = arith.divf %36, %37 : vector<28x168xf32>
    %c0_20 = arith.constant 0 : index
    %c0_21 = arith.constant 0 : index
    %39 = vector.load %arg4[%c0_20, %c0_21] : memref<14x28xf32, #tpu.memory_space<vmem>>, vector<14x28xf32>
    %cst_22 = arith.constant dense<0.000000e+00> : vector<14x168xf32>
    %40 = tpu.matmul %39, %38, %cst_22 {dimension_numbers = #tpu.dot_dimension_numbers<[1], [0], [0], [1], [0, 0, 1, 1], [], []>} : vector<14x28xf32>, vector<28x168xf32>, vector<14x168xf32> -> vector<14x168xf32>
    %c0_23 = arith.constant 0 : index
    %c0_24 = arith.constant 0 : index
    %41 = vector.load %arg5[%c0_23, %c0_24] : memref<168x84xf32, #tpu.memory_space<vmem>>, vector<168x84xf32>
    %cst_25 = arith.constant dense<0.000000e+00> : vector<14x84xf32>
    %42 = tpu.matmul %40, %41, %cst_25 {dimension_numbers = #tpu.dot_dimension_numbers<[1], [0], [0], [1], [0, 0, 1, 1], [], []>} : vector<14x168xf32>, vector<168x84xf32>, vector<14x84xf32> -> vector<14x84xf32>
    %c0_26 = arith.constant 0 : index
    %c0_27 = arith.constant 0 : index
    %c0_28 = arith.constant 0 : index
    %43 = vector.load %arg6[%c0_26, %c0_27, %c0_28] : memref<1x14x84xf32, #tpu.memory_space<vmem>>, vector<1x14x84xf32>
    %44 = vector.shape_cast %43 : vector<1x14x84xf32> to vector<14x84xf32>
    %45 = vector.shape_cast %42 : vector<14x84xf32> to vector<1x14x84xf32>
    tpu.vector_store %arg6[%c0_26, %c0_27, %c0_28], %45 {strides = array<i32>} : memref<1x14x84xf32, #tpu.memory_space<vmem>>, vector<1x14x84xf32>,
    return
  }
  func.func @transform_0(%arg0: i32) -> (i32, i32, i32) {
    %c0_i32 = arith.constant 0 : i32
    %c0_i32_0 = arith.constant 0 : i32
    %c0_i32_1 = arith.constant 0 : i32
    return %arg0, %c0_i32, %c0_i32_0 : i32, i32, i32
  }
  func.func @transform_1(%arg0: i32) -> (i32, i32, i32) {
    %c0_i32 = arith.constant 0 : i32
    %c0_i32_0 = arith.constant 0 : i32
    %c0_i32_1 = arith.constant 0 : i32
    %c0_i32_2 = arith.constant 0 : i32
    return %c0_i32, %c0_i32_0, %c0_i32_1 : i32, i32, i32
  }
  func.func @transform_2(%arg0: i32) -> (i32, i32) {
    %c0_i32 = arith.constant 0 : i32
    %c0_i32_0 = arith.constant 0 : i32
    %c0_i32_1 = arith.constant 0 : i32
    return %c0_i32, %c0_i32_0 : i32, i32
  }
  func.func @transform_3(%arg0: i32) -> (i32, i32) {
    %c0_i32 = arith.constant 0 : i32
    %c0_i32_0 = arith.constant 0 : i32
    %c0_i32_1 = arith.constant 0 : i32
    return %c0_i32, %c0_i32_0 : i32, i32
  }
  func.func @transform_4(%arg0: i32) -> (i32, i32) {
    %c0_i32 = arith.constant 0 : i32
    %c0_i32_0 = arith.constant 0 : i32
    %c0_i32_1 = arith.constant 0 : i32
    return %c0_i32, %c0_i32_0 : i32, i32
  }
  func.func @transform_5(%arg0: i32) -> (i32, i32, i32) {
    %c0_i32 = arith.constant 0 : i32
    %c0_i32_0 = arith.constant 0 : i32
    %c0_i32_1 = arith.constant 0 : i32
    return %arg0, %c0_i32, %c0_i32_0 : i32, i32, i32
  }
}

module attributes {stable_mosaic.version = 11 : i64} {
  func.func @_tail_kernel(%arg0: i32, %arg1: memref<2x400xf32, #tpu.memory_space<vmem>>, %arg2: memref<400x120xbf16, #tpu.memory_space<vmem>>, %arg3: memref<1x120xf32, #tpu.memory_space<vmem>>, %arg4: memref<120x84xbf16, #tpu.memory_space<vmem>>, %arg5: memref<1x84xf32, #tpu.memory_space<vmem>>, %arg6: memref<84x10xbf16, #tpu.memory_space<vmem>>, %arg7: memref<1x10xf32, #tpu.memory_space<vmem>>, %arg8: memref<2x10xf32, #tpu.memory_space<vmem>>) attributes {dimension_semantics = [#tpu.dimension_semantics<parallel>], iteration_bounds = array<i64: 1>, scalar_prefetch = 0 : i64, scratch_operands = 0 : i64, tpu.core_type = #tpu.core_type<tc>, window_params = [{transform_indices = @transform_0, window_bounds = array<i64: 2, 400>}, {pipeline_mode = #tpu.pipeline_mode<synchronous>, transform_indices = @transform_1, window_bounds = array<i64: 400, 120>}, {pipeline_mode = #tpu.pipeline_mode<synchronous>, transform_indices = @transform_2, window_bounds = array<i64: 1, 120>}, {pipeline_mode = #tpu.pipeline_mode<synchronous>, transform_indices = @transform_3, window_bounds = array<i64: 120, 84>}, {pipeline_mode = #tpu.pipeline_mode<synchronous>, transform_indices = @transform_4, window_bounds = array<i64: 1, 84>}, {pipeline_mode = #tpu.pipeline_mode<synchronous>, transform_indices = @transform_5, window_bounds = array<i64: 84, 10>}, {pipeline_mode = #tpu.pipeline_mode<synchronous>, transform_indices = @transform_6, window_bounds = array<i64: 1, 10>}, {transform_indices = @transform_7, window_bounds = array<i64: 2, 10>}]} {
    %c0 = arith.constant 0 : index
    %c0_0 = arith.constant 0 : index
    %0 = vector.load %arg1[%c0, %c0_0] : memref<2x400xf32, #tpu.memory_space<vmem>>, vector<2x400xf32>
    %1 = arith.truncf %0 : vector<2x400xf32> to vector<2x400xbf16>
    %c0_1 = arith.constant 0 : index
    %c0_2 = arith.constant 0 : index
    %2 = vector.load %arg2[%c0_1, %c0_2] : memref<400x120xbf16, #tpu.memory_space<vmem>>, vector<400x120xbf16>
    %cst = arith.constant dense<0.000000e+00> : vector<2x120xf32>
    %3 = tpu.matmul %1, %2, %cst {dimension_numbers = #tpu.dot_dimension_numbers<[1], [0], [0], [1], [0, 0, 1, 1], [], []>} : vector<2x400xbf16>, vector<400x120xbf16>, vector<2x120xf32> -> vector<2x120xf32>
    %c0_3 = arith.constant 0 : index
    %c0_4 = arith.constant 0 : index
    %4 = vector.load %arg3[%c0_3, %c0_4] : memref<1x120xf32, #tpu.memory_space<vmem>>, vector<1x120xf32>
    %5 = vector.broadcast %4 : vector<1x120xf32> to vector<2x120xf32>
    %6 = arith.addf %3, %5 : vector<2x120xf32>
    %7 = arith.negf %6 : vector<2x120xf32>
    %8 = math.exp %7 : vector<2x120xf32>
    %cst_5 = arith.constant 1.000000e+00 : f32
    %9 = vector.broadcast %cst_5 : f32 to vector<2x120xf32>
    %10 = arith.addf %9, %8 : vector<2x120xf32>
    %11 = arith.divf %9, %10 : vector<2x120xf32>
    %12 = arith.truncf %11 : vector<2x120xf32> to vector<2x120xbf16>
    %c0_6 = arith.constant 0 : index
    %c0_7 = arith.constant 0 : index
    %13 = vector.load %arg4[%c0_6, %c0_7] : memref<120x84xbf16, #tpu.memory_space<vmem>>, vector<120x84xbf16>
    %cst_8 = arith.constant dense<0.000000e+00> : vector<2x84xf32>
    %14 = tpu.matmul %12, %13, %cst_8 {dimension_numbers = #tpu.dot_dimension_numbers<[1], [0], [0], [1], [0, 0, 1, 1], [], []>} : vector<2x120xbf16>, vector<120x84xbf16>, vector<2x84xf32> -> vector<2x84xf32>
    %c0_9 = arith.constant 0 : index
    %c0_10 = arith.constant 0 : index
    %15 = vector.load %arg5[%c0_9, %c0_10] : memref<1x84xf32, #tpu.memory_space<vmem>>, vector<1x84xf32>
    %16 = vector.broadcast %15 : vector<1x84xf32> to vector<2x84xf32>
    %17 = arith.addf %14, %16 : vector<2x84xf32>
    %18 = arith.negf %17 : vector<2x84xf32>
    %19 = math.exp %18 : vector<2x84xf32>
    %cst_11 = arith.constant 1.000000e+00 : f32
    %20 = vector.broadcast %cst_11 : f32 to vector<2x84xf32>
    %21 = arith.addf %20, %19 : vector<2x84xf32>
    %22 = arith.divf %20, %21 : vector<2x84xf32>
    %23 = arith.truncf %22 : vector<2x84xf32> to vector<2x84xbf16>
    %c0_12 = arith.constant 0 : index
    %c0_13 = arith.constant 0 : index
    %24 = vector.load %arg6[%c0_12, %c0_13] : memref<84x10xbf16, #tpu.memory_space<vmem>>, vector<84x10xbf16>
    %cst_14 = arith.constant dense<0.000000e+00> : vector<2x10xf32>
    %25 = tpu.matmul %23, %24, %cst_14 {dimension_numbers = #tpu.dot_dimension_numbers<[1], [0], [0], [1], [0, 0, 1, 1], [], []>} : vector<2x84xbf16>, vector<84x10xbf16>, vector<2x10xf32> -> vector<2x10xf32>
    %c0_15 = arith.constant 0 : index
    %c0_16 = arith.constant 0 : index
    %26 = vector.load %arg7[%c0_15, %c0_16] : memref<1x10xf32, #tpu.memory_space<vmem>>, vector<1x10xf32>
    %27 = vector.broadcast %26 : vector<1x10xf32> to vector<2x10xf32>
    %28 = arith.addf %25, %27 : vector<2x10xf32>
    %c0_17 = arith.constant 0 : index
    %c0_18 = arith.constant 0 : index
    %29 = vector.load %arg8[%c0_17, %c0_18] : memref<2x10xf32, #tpu.memory_space<vmem>>, vector<2x10xf32>
    tpu.vector_store %arg8[%c0_17, %c0_18], %28 {strides = array<i32>} : memref<2x10xf32, #tpu.memory_space<vmem>>, vector<2x10xf32>,
    return
  }
  func.func @transform_0(%arg0: i32) -> (i32, i32) {
    %c0_i32 = arith.constant 0 : i32
    %c0_i32_0 = arith.constant 0 : i32
    return %arg0, %c0_i32 : i32, i32
  }
  func.func @transform_1(%arg0: i32) -> (i32, i32) {
    %c0_i32 = arith.constant 0 : i32
    %c0_i32_0 = arith.constant 0 : i32
    %c0_i32_1 = arith.constant 0 : i32
    return %c0_i32, %c0_i32_0 : i32, i32
  }
  func.func @transform_2(%arg0: i32) -> (i32, i32) {
    %c0_i32 = arith.constant 0 : i32
    %c0_i32_0 = arith.constant 0 : i32
    %c0_i32_1 = arith.constant 0 : i32
    return %c0_i32, %c0_i32_0 : i32, i32
  }
  func.func @transform_3(%arg0: i32) -> (i32, i32) {
    %c0_i32 = arith.constant 0 : i32
    %c0_i32_0 = arith.constant 0 : i32
    %c0_i32_1 = arith.constant 0 : i32
    return %c0_i32, %c0_i32_0 : i32, i32
  }
  func.func @transform_4(%arg0: i32) -> (i32, i32) {
    %c0_i32 = arith.constant 0 : i32
    %c0_i32_0 = arith.constant 0 : i32
    %c0_i32_1 = arith.constant 0 : i32
    return %c0_i32, %c0_i32_0 : i32, i32
  }
  func.func @transform_5(%arg0: i32) -> (i32, i32) {
    %c0_i32 = arith.constant 0 : i32
    %c0_i32_0 = arith.constant 0 : i32
    %c0_i32_1 = arith.constant 0 : i32
    return %c0_i32, %c0_i32_0 : i32, i32
  }
  func.func @transform_6(%arg0: i32) -> (i32, i32) {
    %c0_i32 = arith.constant 0 : i32
    %c0_i32_0 = arith.constant 0 : i32
    %c0_i32_1 = arith.constant 0 : i32
    return %c0_i32, %c0_i32_0 : i32, i32
  }
  func.func @transform_7(%arg0: i32) -> (i32, i32) {
    %c0_i32 = arith.constant 0 : i32
    %c0_i32_0 = arith.constant 0 : i32
    return %arg0, %c0_i32 : i32, i32
  }
}

</mosaic_0001>

<bundles_post_ra>
// kernel: lenet_forward.4
= control target key start
LH: loop header
LB: loop body
LE: loop exit
PB: predicated region body
PF: predicated region fallthrough
CT: control target
= control target key end

     0   :  { %s1458_s18 = smov 0   ;;  %s1738_s0 = inlined_call_operand.vmem [shape: f32[2,14,84], index: 0, kind: input, shape index: {}]   ;;  %s1739_s1 = inlined_call_operand.vmem [shape: bf16[5,84,160], index: 1, kind: input, shape index: {}]   ;;  %s1740_s2 = inlined_call_operand.vmem [shape: f32[1,160], index: 2, kind: input, shape index: {}]   ;;  %s1741_s3 = inlined_call_operand.vmem [shape: f32[5,10], index: 3, kind: input, shape index: {}]   ;;  %s1742_s4 = inlined_call_operand.vmem [shape: f32[160,80], index: 4, kind: input, shape index: {}]   ;;  %s1743_s5 = inlined_call_operand.vmem [shape: f32[2,5,80], index: 5, kind: output, shape index: {}]  }
   0x1 LB: > { %s1118_s19 = sadd.s32 4294967295, %s1422_s18   ;;  %p1122_p0 = scmp.ge.s32.totalorder %s1422_s18, 1  ;;  %s1422_s18 = sphi %s1458_s18, %s15_s18  }
   0x2   : > { %p187_p1 = scmp.lt.s32.totalorder %s1422_s18, 3 }
   0x4   : > { %p188_p2 = pnand %p1122_p0, %p187_p1 }
   0x5   : > { %v1315_v0 = vld [vmem:[%s1739_s1 + $0x5c] ss:$8 sps:$4 sm:$0xff] (!%p188_p2)   ;;  %v1424_v2 = vmov (!%p188_p2), 0   ;;  %v1319_v3 = vld [vmem:[%s1739_s1 + $0x58] ss:$8 sps:$4 sm:$0xff] (!%p188_p2)   ;;  %p214_p3 = scmp.lt.s32.totalorder (!%p188_p2), %s1118_s19, 1 }
   0x6   : > { %191 = sbr.rel (%p188_p2) target bundleno = 757 (0x2f5), region = 40  ;;  %v1317_v1 = vld [vmem:[%s1739_s1 + $0xb4] ss:$8 sps:$4 sm:$0xff] (!%p188_p2)   ;;  %355 = vmatprep.mubr.bf16.mxu1 (!%p188_p2), %v1424_v2  ;;  %582 = vmatprep.mubr.bf16.mxu0 (!%p188_p2), %v1424_v2  ;;  %v1320_v4 = vld [vmem:[%s1739_s1 + $0xb0] ss:$8 sps:$4 sm:$0xff] (!%p188_p2)   ;;  %vm316_vm0 = vcmask (!%p188_p2), 1041408  }
   0x7   : > { %323 = vmatprep.subr.bf16.mxu1 (!%p188_p2), %v1315_v0  ;;  %550 = vmatprep.subr.bf16.mxu0 (!%p188_p2), %v1317_v1  ;;  %v1321_v5 = vld [vmem:[%s1739_s1 + $0x6c] ss:$8 sps:$4 sm:$0xff] (!%p188_p2)   ;;  %v1325_v7 = vld [vmem:[%s1739_s1 + $0x68] ss:$8 sps:$4 sm:$0xff] (!%p188_p2)   ;;  %v1327_v9 = vld [vmem:[%s1739_s1 + $0x7c] ss:$8 sps:$4 sm:$0xff] (!%p188_p2)  }
   0x8   : > { %324 = vmatpush1.bf16.msra.mxu1 (!%p188_p2), %v1319_v3  ;;  %551 = vmatpush1.bf16.msra.mxu0 (!%p188_p2), %v1320_v4  ;;  %v1323_v6 = vld [vmem:[%s1739_s1 + $0xc4] ss:$8 sps:$4 sm:$0xff] (!%p188_p2)   ;;  %v1326_v8 = vld [vmem:[%s1739_s1 + $0xc0] ss:$8 sps:$4 sm:$0xff] (!%p188_p2)   ;;  %v1329_v10 = vld [vmem:[%s1739_s1 + $0xd4] ss:$8 sps:$4 sm:$0xff] (!%p188_p2)  }
   0x9   : > { %325 = vmatprep.subr.bf16.mxu1 (!%p188_p2), %v1321_v5  ;;  %552 = vmatprep.subr.bf16.mxu0 (!%p188_p2), %v1323_v6  ;;  %v1331_v11 = vld [vmem:[%s1739_s1 + $0x78] ss:$8 sps:$4 sm:$0xff] (!%p188_p2)   ;;  %v1333_v13 = vld [vmem:[%s1739_s1 + $0x8c] ss:$8 sps:$4 sm:$0xff] (!%p188_p2)   ;;  %v1337_v15 = vld [vmem:[%s1739_s1 + $0x88] ss:$8 sps:$4 sm:$0xff] (!%p188_p2)  }
   0xa   : > { %v1332_v12 = vld [vmem:[%s1739_s1 + $0xd0] ss:$8 sps:$4 sm:$0xff] (!%p188_p2)   ;;  %v1335_v14 = vld [vmem:[%s1739_s1 + $0xe4] ss:$8 sps:$4 sm:$0xff] (!%p188_p2)   ;;  %v1338_v16 = vld [vmem:[%s1739_s1 + $0xe0] ss:$8 sps:$4 sm:$0xff] (!%p188_p2)  }
   0xb   : > { %v1339_v17 = vld [vmem:[%s1739_s1 + $0x9c] ss:$8 sps:$4 sm:$0xff] (!%p188_p2)   ;;  %v1136_v19 = vld [vmem:[%s1739_s1 + $0xa8] sm:$0x33] (!%p188_p2)  ;;  %v1343_v21 = vld [vmem:[%s1739_s1 + $0x98] ss:$8 sps:$4 sm:$0xff] (!%p188_p2)  }
   0xc   : > { %326 = vmatpush1.bf16.msra.mxu1 (!%p188_p2), %v1325_v7  ;;  %553 = vmatpush1.bf16.msra.mxu0 (!%p188_p2), %v1326_v8  ;;  %v1341_v18 = vld [vmem:[%s1739_s1 + $0xf4] ss:$8 sps:$4 sm:$0xff] (!%p188_p2)   ;;  %v1175_v20 = vld [vmem:[%s1739_s1 + $0x100] sm:$0x33] (!%p188_p2)  ;;  %v1344_v22 = vld [vmem:[%s1739_s1 + $0xf0] ss:$8 sps:$4 sm:$0xff] (!%p188_p2)   ;;  %v1148_v23 = vcombine.high (!%p188_p2), %v1136_v19, %v1136_v19  ;;  %v1147_v25 = vcombine.low (!%p188_p2), %v1136_v19, %v1136_v19 }
   0xd   : > { %s1745_s19 = smov (!%p214_p3, %s1118_s19), 1  ;;  %327 = vmatprep.subr.bf16.mxu1 %v1327_v9  ;;  %554 = vmatprep.subr.bf16.mxu0 %v1329_v10  ;;  %v1187_v24 = vcombine.high %v1175_v20, %v1175_v20  ;;  %v1186_v26 = vcombine.low %v1175_v20, %v1175_v20  ;;  %v1351_v30 = vld [vmem:[%s1739_s1 + $0x4] ss:$8 sps:$4 sm:$0xff]   ;;  %v1349_v38 = vld [vmem:[%s1739_s1] ss:$8 sps:$4 sm:$0xff]   ;;  %vm312_vm1 = vcmask 687104  }
   0xe   : > { %s1250_s25 = sshll.u32 %s1745_s19, 4  ;;  %v318_v33 = vsel %vm316_vm0, %v1147_v25, 0  ;;  %v1354_v35 = vld [vmem:[%s1739_s1 + $0x10c] ss:$8 sps:$4 sm:$0xff]   ;;  %v1352_v39 = vld [vmem:[%s1739_s1 + $0x108] ss:$8 sps:$4 sm:$0xff]  }
   0xf   : > { %s218_s15 = scalar_lea.vmem %s1738_s0, %s1250_s25  ;;  %v545_v34 = vsel %vm316_vm0, %v1186_v26, 0  ;;  %v1357_v41 = vld [vmem:[%s1739_s1 + $0x14] ss:$8 sps:$4 sm:$0xff]   ;;  %v1355_v43 = vld [vmem:[%s1739_s1 + $0x10] ss:$8 sps:$4 sm:$0xff]   ;;  %v1425_v19 = vmov 0.0  }
  0x10   : > { %328 = vmatpush1.bf16.msra.mxu1 %v1331_v11  ;;  %555 = vmatpush1.bf16.msra.mxu0 %v1332_v12  ;;  %v224_v27 = vld [vmem:[%s218_s15] sm:$0xff]  ;;  %v225_v28 = vld [vmem:[%s218_s15 + $0x8] sm:$0x3f]  ;;  %v1369_v49 = vld [vmem:[%s1739_s1 + $0x34] ss:$8 sps:$4 sm:$0xff]   ;;  %vm1427_vm2 = vmmov 1  }
  0x11   : > { %329 = vmatprep.subr.bf16.mxu1 %v1333_v13  ;;  %556 = vmatprep.subr.bf16.mxu0 %v1335_v14  ;;  %v1540_v29 = vpack.c.bf16 %v225_v28, %v224_v27  ;;  %v1360_v42 = vld [vmem:[%s1739_s1 + $0x11c] ss:$8 sps:$4 sm:$0xff]   ;;  %v1358_v44 = vld [vmem:[%s1739_s1 + $0x118] ss:$8 sps:$4 sm:$0xff]   ;;  %v1366_v46 = vld [vmem:[%s1739_s1 + $0x12c] ss:$8 sps:$4 sm:$0xff]  }
  0x12   : > { %v1363_v45 = vld [vmem:[%s1739_s1 + $0x24] ss:$8 sps:$4 sm:$0xff]   ;;  %v1361_v47 = vld [vmem:[%s1739_s1 + $0x20] ss:$8 sps:$4 sm:$0xff]   ;;  %v1367_v51 = vld [vmem:[%s1739_s1 + $0x30] ss:$8 sps:$4 sm:$0xff]  }
  0x13   : > { %v251_v31 = vshrl.u32 %v1540_v29, 16  ;;  %v253_v32 = vshll.u32 %v1540_v29, 16  ;;  %v485_v37 = vrot.slane %v1540_v29, 1  ;;  %v1364_v48 = vld [vmem:[%s1739_s1 + $0x128] ss:$8 sps:$4 sm:$0xff]   ;;  %v969_v20 = vld [vmem:[%s1742_s4] sm:$0xff]  ;;  %vm1252_vm3 = vmpackc.low %vm316_vm0, %vm1427_vm2 }
  0x14   : > { %330 = vmatpush1.bf16.msra.mxu1 %v1337_v15  ;;  %557 = vmatpush1.bf16.msra.mxu0 %v1338_v16  ;;  %v1372_v50 = vld [vmem:[%s1739_s1 + $0x13c] ss:$8 sps:$4 sm:$0xff]   ;;  %v1370_v52 = vld [vmem:[%s1739_s1 + $0x138] ss:$8 sps:$4 sm:$0xff]   ;;  %v1378_v54 = vld [vmem:[%s1739_s1 + $0x14c] ss:$8 sps:$4 sm:$0xff]  }
  0x15   : > { %331 = vmatprep.subr.bf16.mxu1 %v1339_v17  ;;  %558 = vmatprep.subr.bf16.mxu0 %v1341_v18  ;;  %v255_v36 = vrot.slane %v253_v32, 1  ;;  %v1375_v53 = vld [vmem:[%s1739_s1 + $0x44] ss:$8 sps:$4 sm:$0xff]   ;;  %v237_v55 = vld [vmem:[%s1739_s1 + $0x50] sm:$0x33]  ;;  %v609_v63 = vrot.slane %v251_v31, 1 }
  0x16   : > { %v1200_v56 = vld [vmem:[%s1739_s1 + $0x158] sm:$0x33]  ;;  %v1373_v57 = vld [vmem:[%s1739_s1 + $0x40] ss:$8 sps:$4 sm:$0xff]   ;;  %v1162_v59 = vcombine.high %v237_v55, %v237_v55  ;;  %v1161_v61 = vcombine.low %v237_v55, %v237_v55  ;;  %v610_v0 = vrot.slane %v253_v32, 2  ;;  %v735_v18 = vrot.slane %v1540_v29, 2 }
  0x17   : > { %v256_v40 = vor.u32 %v255_v36, %v251_v31  ;;  %v1376_v58 = vld [vmem:[%s1739_s1 + $0x148] ss:$8 sps:$4 sm:$0xff]   ;;  %v1212_v60 = vcombine.high %v1200_v56, %v1200_v56  ;;  %v1211_v62 = vcombine.low %v1200_v56, %v1200_v56  ;;  %v1385_v4 = vld [vmem:[%s1739_s1 + $0x164] ss:$8 sps:$4 sm:$0xff]   ;;  %v1388_v7 = vld [vmem:[%s1739_s1 + $0x174] ss:$8 sps:$4 sm:$0xff]  }
  0x18   : > { %332 = vmatpush1.bf16.msra.mxu1 %v1343_v21  ;;  %559 = vmatpush1.bf16.msra.mxu0 %v1344_v22  ;;  %v424_v1 = vsel %vm316_vm0, %v1161_v61, 0  ;;  %v611_v5 = vor.u32 %v610_v0, %v609_v63  ;;  %v1383_v6 = vld [vmem:[%s1739_s1 + $0x160] ss:$8 sps:$4 sm:$0xff]   ;;  %v1386_v8 = vld [vmem:[%s1739_s1 + $0x170] ss:$8 sps:$4 sm:$0xff]   ;;  %vm888_vm4 = vcmask 80896  }
  0x19   : > { %1149 = vmatprep.subr.msk.bf16.mxu1 %vm316_vm0, %v1148_v23  ;;  %1188 = vmatprep.subr.msk.bf16.mxu0 %vm316_vm0, %v1187_v24  ;;  %v671_v3 = vsel %vm316_vm0, %v1211_v62, 0  ;;  %v1391_v9 = vld [vmem:[%s1739_s1 + $0x184] ss:$8 sps:$4 sm:$0xff]   ;;  %v1389_v10 = vld [vmem:[%s1739_s1 + $0x180] ss:$8 sps:$4 sm:$0xff]   ;;  %v971_v22 = vld [vmem:[%s1742_s4 + $0x10] sm:$0xff] }
  0x1a   : > { %v1394_v11 = vld [vmem:[%s1739_s1 + $0x194] ss:$8 sps:$4 sm:$0xff]   ;;  %v1397_v12 = vld [vmem:[%s1739_s1 + $0x1a4] ss:$8 sps:$4 sm:$0xff]   ;;  %v1395_v14 = vld [vmem:[%s1739_s1 + $0x1a0] ss:$8 sps:$4 sm:$0xff]  }
  0x1b   : > { %v1225_v13 = vld [vmem:[%s1739_s1 + $0x1b0] sm:$0x33]  ;;  %v970_v21 = vld [vmem:[%s1742_s4 + $0x8] sm:$0xff]  ;;  %v1426_v23 = vmov 0.0|0.0   ;;  %v972_v25 = vld [vmem:[%s1742_s4 + $0x18] sm:$0xff]  ;;  %vm989_vm5 = vcmask 261120  }
  0x1c   : > { %334 = vmatpush1.bf16.msra.mxu1 %v318_v33  ;;  %561 = vmatpush1.bf16.msra.mxu0 %v545_v34  ;;  %v1237_v15 = vcombine.high %v1225_v13, %v1225_v13  ;;  %v1236_v16 = vcombine.low %v1225_v13, %v1225_v13  ;;  %v1258_v24 = vpack.c.bf16 %v970_v21, %v969_v20  ;;  %v973_v27 = vld [vmem:[%s1742_s4 + $0x20] sm:$0xff]  ;;  %v974_v28 = vld [vmem:[%s1742_s4 + $0x28] sm:$0xff]  ;;  %v976_v31 = vld [vmem:[%s1742_s4 + $0x38] sm:$0xff]  ;;  %s1125_s15 = sshll.u32 %s1745_s19, 3  ;;  %vm1063_vm6 = vcmask 651264  }
  0x1d   : > { %429 = vmatprep.subr.bf16.mxu1 %v1351_v30  ;;  %676 = vmatprep.subr.bf16.mxu0 %v1354_v35  ;;  %v1261_v26 = vpack.c.bf16 %v972_v25, %v971_v22  ;;  %v975_v30 = vld [vmem:[%s1742_s4 + $0x30] sm:$0xff]  ;;  %v977_v33 = vld [vmem:[%s1742_s4 + $0x40] sm:$0xff]  ;;  %v978_v34 = vld [vmem:[%s1742_s4 + $0x48] sm:$0xff]  ;;  %s222_s20 = scalar_lea.vmem %s1743_s5, %s1125_s15 }
  0x1e   : > { %v795_v17 = vsel %vm316_vm0, %v1236_v16, 0  ;;  %v1267_v32 = vpack.c.bf16 %v976_v31, %v975_v30  ;;  %v1270_v35 = vpack.c.bf16 %v978_v34, %v977_v33  ;;  %v979_v36 = vld [vmem:[%s1742_s4 + $0x50] sm:$0xff]  ;;  %v847_v55 = vld [vmem:[%s1740_s2] sm:$0x3] }
  0x1f   : > { %1150 = vmatmul.mubr.msk.bf16.vlgmr.msra.gmra.mrb[0].mxu1 %vm312_vm1, %v256_v40  ;;  %1189 = vmatmul.mubr.msk.bf16.vlgmr.msra.gmra.mrb[0].mxu0 %vm312_vm1, %v485_v37  ;;  %v980_v37 = vld [vmem:[%s1742_s4 + $0x58] sm:$0xff]  ;;  %v982_v40 = vld [vmem:[%s1742_s4 + $0x68] sm:$0xff]  ;;  %v887_v25 = vld [vmem:[%s1741_s3] sm:$0x1f] }
  0x20   : > { %430 = vmatpush1.bf16.msra.mxu1 %v1349_v38  ;;  %677 = vmatpush1.bf16.msra.mxu0 %v1352_v39  ;;  %v1273_v38 = vpack.c.bf16 %v980_v37, %v979_v36  ;;  %v981_v39 = vld [vmem:[%s1742_s4 + $0x60] sm:$0xff] }
  0x21   : > { %431 = vmatprep.subr.bf16.mxu1 %v1357_v41  ;;  %678 = vmatprep.subr.bf16.mxu0 %v1360_v42  ;;  %v1276_v41 = vpack.c.bf16 %v982_v40, %v981_v39  ;;  %v983_v42 = vld [vmem:[%s1742_s4 + $0x70] sm:$0xff] }
  0x22   : > { %461 = vmatprep.mubr.bf16.mxu1 %v1424_v2  ;;  %708 = vmatprep.mubr.bf16.mxu0 %v1424_v2 }
  0x24   : > { %432 = vmatpush1.bf16.msra.mxu1 %v1355_v43  ;;  %679 = vmatpush1.bf16.msra.mxu0 %v1358_v44  ;;  %v984_v43 = vld [vmem:[%s1742_s4 + $0x78] sm:$0xff] }
  0x25   : > { %433 = vmatprep.subr.bf16.mxu1 %v1363_v45  ;;  %680 = vmatprep.subr.bf16.mxu0 %v1366_v46  ;;  %v1279_v44 = vpack.c.bf16 %v984_v43, %v983_v42  ;;  %v985_v45 = vld [vmem:[%s1742_s4 + $0x80] sm:$0xff]  ;;  %v986_v46 = vld [vmem:[%s1742_s4 + $0x88] sm:$0xff] }
  0x28   : > { %434 = vmatpush1.bf16.msra.mxu1 %v1361_v47  ;;  %681 = vmatpush1.bf16.msra.mxu0 %v1364_v48  ;;  %v1282_v47 = vpack.c.bf16 %v986_v46, %v985_v45 }
  0x29   : > { %435 = vmatprep.subr.bf16.mxu1 %v1369_v49  ;;  %682 = vmatprep.subr.bf16.mxu0 %v1372_v50 }
  0x2c   : > { %436 = vmatpush1.bf16.msra.mxu1 %v1367_v51  ;;  %683 = vmatpush1.bf16.msra.mxu0 %v1370_v52  ;;  %v849_v52 = vlaneseq }
  0x2d   : > { %437 = vmatprep.subr.bf16.mxu1 %v1375_v53  ;;  %684 = vmatprep.subr.bf16.mxu0 %v1378_v54 }
  0x2e   : > { %v850_v53 = vshrl.u32 %v849_v52, 7 }
  0x30   : > { %438 = vmatpush1.bf16.msra.mxu1 %v1373_v57  ;;  %685 = vmatpush1.bf16.msra.mxu0 %v1376_v58  ;;  %v851_v54 = vsub.s32 0, %v850_v53  ;;  %v855_v56 = vsub.s32 1, %v850_v53 }
  0x31   : > { %1163 = vmatprep.subr.msk.bf16.mxu1 %vm316_vm0, %v1162_v59  ;;  %1213 = vmatprep.subr.msk.bf16.mxu0 %vm316_vm0, %v1212_v60 }
  0x32   : > { %v852_v57 = vrot.slane %v847_v55, %v851_v54  ;;  %v856_v59 = vrot.slane %v847_v55, %v855_v56 }
  0x34   : > { %440 = vmatpush1.bf16.msra.mxu1 %v424_v1  ;;  %687 = vmatpush1.bf16.msra.mxu0 %v671_v3 }
  0x35   : > { %800 = vmatprep.subr.bf16.mxu0 %v1385_v4  ;;  %1257 = vmatprep.subr.bf16.mxu1 %v1426_v23 }
  0x37   : > { %1164 = vmatmul.mubr.msk.bf16.vlgmr.msra.gmra.mrb[0].mxu1 %vm312_vm1, %v1540_v29  ;;  %1214 = vmatmul.mubr.msk.bf16.vlgmr.msra.gmra.mrb[0].mxu0 %vm312_vm1, %v611_v5  ;;  %v1264_v29 = vpack.c.bf16 %v974_v28, %v973_v27  ;;  %v988_v27 = vld [vmem:[%s1742_s4 + $0x98] sm:$0xff] }
  0x38   : > { %801 = vmatpush1.bf16.msra.mxu0 %v1383_v6  ;;  %832 = vmatprep.mubr.bf16.mxu0 %v1424_v2  ;;  %v1392_v2 = vld [vmem:[%s1739_s1 + $0x190] ss:$8 sps:$4 sm:$0xff]  }
  0x39   : > { %802 = vmatprep.subr.bf16.mxu0 %v1388_v7  ;;  %1259 = vmatpush1.bf16.msra.mxu1 %v1258_v24 }
  0x3a   : > { %1260 = vmatprep.subr.bf16.mxu1 %v1426_v23 }
  0x3c   : > { %803 = vmatpush1.bf16.msra.mxu0 %v1386_v8 }
  0x3d   : > { %804 = vmatprep.subr.bf16.mxu0 %v1391_v9  ;;  %1262 = vmatpush1.bf16.msra.mxu1 %v1261_v26  ;;  %v987_v26 = vld [vmem:[%s1742_s4 + $0x90] sm:$0xff] }
  0x3e   : > { %1263 = vmatprep.subr.bf16.mxu1 %v1426_v23  ;;  %v1285_v28 = vpack.c.bf16 %v988_v27, %v987_v26 }
  0x40   : > { %805 = vmatpush1.bf16.msra.mxu0 %v1389_v10 }
  0x41   : > { %806 = vmatprep.subr.bf16.mxu0 %v1394_v11  ;;  %1265 = vmatpush1.bf16.msra.mxu1 %v1264_v29 }
  0x42   : > { %1266 = vmatprep.subr.bf16.mxu1 %v1426_v23 }
  0x44   : > { %807 = vmatpush1.bf16.msra.mxu0 %v1392_v2 }
  0x45   : > { %808 = vmatprep.subr.bf16.mxu0 %v1397_v12  ;;  %1268 = vmatpush1.bf16.msra.mxu1 %v1267_v32 }
  0x46   : > { %1269 = vmatprep.subr.bf16.mxu1 %v1426_v23 }
  0x48   : > { %809 = vmatpush1.bf16.msra.mxu0 %v1395_v14 }
  0x49   : > { %1238 = vmatprep.subr.msk.bf16.mxu0 %vm316_vm0, %v1237_v15  ;;  %1271 = vmatpush1.bf16.msra.mxu1 %v1270_v35 }
  0x4a   : > { %1272 = vmatprep.subr.bf16.mxu1 %v1426_v23 }
  0x4c   : > { %811 = vmatpush1.bf16.msra.mxu0 %v795_v17 }
  0x4d   : > { %1274 = vmatpush1.bf16.msra.mxu1 %v1273_v38 }
  0x4e   : > { %1275 = vmatprep.subr.bf16.mxu1 %v1426_v23 }
  0x4f   : > { %1239 = vmatmul.mubr.msk.bf16.vlgmr.msra.gmra.mrb[0].mxu0 %vm312_vm1, %v735_v18 }
  0x50   : > { %962 = vmatprep.mubr.f32.mxu0 %v1425_v19 }
  0x51   : > { %1277 = vmatpush1.bf16.msra.mxu1 %v1276_v41 }
  0x52   : > { %1278 = vmatprep.subr.bf16.mxu1 %v1426_v23 }
  0x55   : > { %1280 = vmatpush1.bf16.msra.mxu1 %v1279_v44 }
  0x56   : > { %1281 = vmatprep.subr.bf16.mxu1 %v1426_v23 }
  0x59   : > { %1283 = vmatpush1.bf16.msra.mxu1 %v1282_v47 }
  0x5a   : > { %1284 = vmatprep.subr.bf16.mxu1 %v1426_v23 }
  0x5d   : > { %1286 = vmatpush1.bf16.msra.mxu1 %v1285_v28 }
 0x10a   : > { %v463_v48 = vpop.f32.mrb[0].mxu1 }
 0x10b   : > { %v465_v49 = vpop.f32.mrb[1].mxu1 }
 0x10c   : > { %v467_v50 = vpop.f32.mrb[2].mxu1 }
 0x10d   : > { %v469_v51 = vpop.f32.mrb[3].mxu1 }
 0x122   : > { %v834_v58 = vpop.f32.mrb[0].mxu0 }
 0x123   : > { %v1287_v60 = vadd.f32 %v834_v58, %v463_v48  ;;  %v836_v61 = vpop.f32.mrb[1].mxu0 }
 0x124   : > { %v1288_v62 = vadd.f32 %v836_v61, %v465_v49  ;;  %v838_v63 = vpop.f32.mrb[2].mxu0 }
 0x125   : > { %v859_v0 = vadd.f32 %v1287_v60, %v852_v57  ;;  %v1289_v1 = vadd.f32 %v838_v63, %v467_v50  ;;  %v840_v3 = vpop.f32.mrb[3].mxu0 }
 0x126   : > { %v860_v4 = vadd.f32 %v1288_v62, %v856_v59  ;;  %v1290_v5 = vadd.f32 %v840_v3, %v469_v51 }
 0x127   : > { %v1240_v6 = vmul.f32 -1.442695, %v859_v0  ;;  %v861_v7 = vadd.f32 %v1289_v1, %v852_v57 }
 0x128   : > { %v1241_v8 = vmul.f32 -1.442695, %v860_v4  ;;  %v862_v9 = vadd.f32 %v1290_v5, %v856_v59 }
 0x129   : > { %1400 = vpow2.f32 %v1240_v6  ;;  %v1242_v10 = vmul.f32 -1.442695, %v861_v7 }
 0x12a   : > { %1402 = vpow2.f32 %v1241_v8  ;;  %v1243_v11 = vmul.f32 -1.442695, %v862_v9 }
 0x12b   : > { %1404 = vpow2.f32 %v1242_v10 }
 0x12c   : > { %1406 = vpow2.f32 %v1243_v11 }
 0x133   : > { %v1401_v2 = vpop.eup %1400 }
 0x134   : > { %v1403_v12 = vpop.eup %1402  ;;  %v875_v13 = vadd.f32 1.0, %v1401_v2 }
 0x135   : > { %v1405_v14 = vpop.eup %1404  ;;  %v876_v15 = vadd.f32 1.0, %v1403_v12 }
 0x136   : > { %v1407_v16 = vpop.eup %1406  ;;  %1408 = vrcp.f32 %v875_v13  ;;  %v877_v17 = vadd.f32 1.0, %v1405_v14 }
 0x137   : > { %1410 = vrcp.f32 %v876_v15  ;;  %v878_v18 = vadd.f32 1.0, %v1407_v16 }
 0x138   : > { %1412 = vrcp.f32 %v877_v17 }
 0x139   : > { %1414 = vrcp.f32 %v878_v18 }
 0x140   : > { %v1409_v19 = vpop.eup %1408 }
 0x141   : > { %v1411_v20 = vpop.eup %1410 }
 0x142   : > { %v1413_v21 = vpop.eup %1412 }
 0x143   : > { %v1415_v22 = vpop.eup %1414  ;;  %v1254_v23 = vpack.c.bf16 %v1413_v21, %v1409_v19 }
 0x144   : > { %v1251_v24 = vpack.c.bf16 %v1415_v22, %v1411_v20 }
 0x146   : > { %1253 = vmatprep.subr.msk.bf16.mxu0 %vm1252_vm3, %v1251_v24 }
 0x147   : > { %1256 = vmatpush1.bf16.msk.msra.mxu0 %vm1252_vm3, %v1254_v23 }
 0x14a   : > { %1246 = vmatmul.mubr.msk.f32.vlgmr.msra.gmra.mrb[4].mxu0 %vm888_vm4, %v887_v25 }
 0x21d   : > { %v964_v29 = vpop.f32.mrb[4].mxu0 }
 0x21e   : > { %v966_v30 = vpop.f32.mrb[5].mxu0 }
 0x21f   : > { %1247 = vmatprep.mubr.msk.f32.mxu1 %vm989_vm5, %v966_v30 }
 0x220   : > { %1058 = vmatmul.mubr.f32.vlgmr.msra.gmra.mrb[4].mxu1 %v964_v29 }
 0x2f3   : > { %v1059_v31 = vpop.f32.mrb[4].mxu1 }
 0x2f4   : > { %1064 = vst.msk [vmem:[%s222_s20] sm:$0x1f] %vm1063_vm6, %v1059_v31  ;;  %v1061_v32 = vpop.f32.mrb[5].mxu1 }
 0x2f5 PF: > { %s15_s18 = sadd.s32 1, %s1422_s18  }
 0x2f6   : > { %p12_p4 = scmp.ge.s32.totalorder %s15_s18, 4  }
 0x2f8   :  { %14 = sbr.rel (!%p12_p4) target bundleno = 1 (0x1), region = 74 }

// kernel: lenet_forward.3
= control target key start
LH: loop header
LB: loop body
LE: loop exit
PB: predicated region body
PF: predicated region fallthrough
CT: control target
= control target key end

     0   :  { %s1292_s18 = smov 0   ;;  %s1482_s0 = inlined_call_operand.vmem [shape: f32[2,32,32], index: 0, kind: input, shape index: {}]   ;;  %s1483_s1 = inlined_call_operand.vmem [shape: bf16[5,32,168], index: 1, kind: input, shape index: {}]   ;;  %s1484_s2 = inlined_call_operand.vmem [shape: f32[1,168], index: 2, kind: input, shape index: {}]   ;;  %s1485_s3 = inlined_call_operand.vmem [shape: f32[14,28], index: 3, kind: input, shape index: {}]   ;;  %s1486_s4 = inlined_call_operand.vmem [shape: f32[168,84], index: 4, kind: input, shape index: {}]   ;;  %s1487_s5 = inlined_call_operand.vmem [shape: f32[2,14,84], index: 5, kind: output, shape index: {}]  }
   0x1 LB: > { %s1031_s19 = sadd.s32 4294967295, %s1256_s18   ;;  %p1035_p0 = scmp.ge.s32.totalorder %s1256_s18, 1  ;;  %s1256_s18 = sphi %s1292_s18, %s15_s18  }
   0x2   : > { %p187_p1 = scmp.lt.s32.totalorder %s1256_s18, 3 }
   0x4   : > { %p188_p2 = pnand %p1035_p0, %p187_p1 }
   0x5   : > { %v1188_v0 = vld [vmem:[%s1483_s1 + $0x4] ss:$8 sps:$4 sm:$0xff] (!%p188_p2)   ;;  %p215_p3 = scmp.lt.s32.totalorder (!%p188_p2), %s1031_s19, 1  ;;  %v1190_v1 = vld [vmem:[%s1483_s1] ss:$8 sps:$4 sm:$0xff] (!%p188_p2)   ;;  %v1258_v2 = vmov (!%p188_p2), 0   ;;  %v710_v58 = vlaneseq (!%p188_p2) }
   0x6   : > { %191 = sbr.rel (%p188_p2) target bundleno = 757 (0x2f5), region = 40  ;;  %393 = vmatprep.mubr.bf16.mxu0 (!%p188_p2), %v1258_v2  ;;  %316 = vmatprep.mubr.bf16.mxu1 (!%p188_p2), %v1258_v2  ;;  %v1191_v3 = vld [vmem:[%s1483_s1 + $0x14] ss:$8 sps:$4 sm:$0xff] (!%p188_p2)   ;;  %v1193_v4 = vld [vmem:[%s1483_s1 + $0x10] ss:$8 sps:$4 sm:$0xff] (!%p188_p2)   ;;  %vm277_vm0 = vcmask (!%p188_p2), 261120  }
   0x7   : > { %361 = vmatprep.subr.bf16.mxu0 (!%p188_p2), %v1188_v0  ;;  %v1196_v5 = vld [vmem:[%s1483_s1 + $0x44] ss:$8 sps:$4 sm:$0xff] (!%p188_p2)   ;;  %v1194_v9 = vld [vmem:[%s1483_s1 + $0x40] ss:$8 sps:$4 sm:$0xff] (!%p188_p2)   ;;  %v1199_v11 = vld [vmem:[%s1483_s1 + $0x54] ss:$8 sps:$4 sm:$0xff] (!%p188_p2)  }
   0x8   : > { %362 = vmatpush1.bf16.msra.mxu0 (!%p188_p2), %v1190_v1  ;;  %v1197_v13 = vld [vmem:[%s1483_s1 + $0x50] ss:$8 sps:$4 sm:$0xff] (!%p188_p2)   ;;  %v1202_v15 = vld [vmem:[%s1483_s1 + $0x64] ss:$8 sps:$4 sm:$0xff] (!%p188_p2)   ;;  %v1211_v19 = vld [vmem:[%s1483_s1 + $0x20] ss:$8 sps:$4 sm:$0xff] (!%p188_p2)  }
   0x9   : > { %363 = vmatprep.subr.bf16.mxu0 (!%p188_p2), %v1191_v3  ;;  %v1209_v18 = vld [vmem:[%s1483_s1 + $0x24] ss:$8 sps:$4 sm:$0xff] (!%p188_p2)   ;;  %v1212_v21 = vld [vmem:[%s1483_s1 + $0x34] ss:$8 sps:$4 sm:$0xff] (!%p188_p2)   ;;  %v1214_v23 = vld [vmem:[%s1483_s1 + $0x30] ss:$8 sps:$4 sm:$0xff] (!%p188_p2)  }
   0xa   : > { %284 = vmatprep.subr.bf16.mxu1 (!%p188_p2), %v1209_v18  ;;  %vm241_vm1 = vsmask.f32 (!%p188_p2), 7424  ;;  %vm421_vm2 = vcmask (!%p188_p2), 1046528   ;;  %v1200_v30 = vld [vmem:[%s1483_s1 + $0x60] ss:$8 sps:$4 sm:$0xff] (!%p188_p2)   ;;  %vm617_vm4 = vcmask (!%p188_p2), 1045504  }
   0xb   : > { %285 = vmatpush1.bf16.msra.mxu1 (!%p188_p2), %v1211_v19  ;;  %v1205_v31 = vld [vmem:[%s1483_s1 + $0x74] ss:$8 sps:$4 sm:$0xff] (!%p188_p2)   ;;  %v1203_v34 = vld [vmem:[%s1483_s1 + $0x70] ss:$8 sps:$4 sm:$0xff] (!%p188_p2)   ;;  %v1208_v35 = vld [vmem:[%s1483_s1 + $0x84] ss:$8 sps:$4 sm:$0xff] (!%p188_p2)  }
   0xc   : > { %364 = vmatpush1.bf16.msra.mxu0 (!%p188_p2), %v1193_v4  ;;  %286 = vmatprep.subr.bf16.mxu1 (!%p188_p2), %v1212_v21  ;;  %vm517_vm3 = vsmask.f32 (!%p188_p2), 6400  ;;  %v1206_v43 = vld [vmem:[%s1483_s1 + $0x80] ss:$8 sps:$4 sm:$0xff] (!%p188_p2)   ;;  %v1217_v44 = vld [vmem:[%s1483_s1 + $0x94] ss:$8 sps:$4 sm:$0xff] (!%p188_p2)  }
   0xd   : > { %s1489_s19 = smov (!%p215_p3, %s1031_s19), 1  ;;  %451 = vmatprep.subr.bf16.mxu0 %v1196_v5  ;;  %v1215_v45 = vld [vmem:[%s1483_s1 + $0x90] ss:$8 sps:$4 sm:$0xff]   ;;  %v1259_v49 = vmov 0.0   ;;  %v711_v59 = vshrl.u32 %v710_v58, 7  ;;  %vm785_vm5 = vcmask 1043456  }
   0xe   : > { %s1102_s28 = sshll.u32 %s1489_s19, 5  ;;  %v708_v61 = vld [vmem:[%s1484_s2] sm:$0x3]  ;;  %vm1260_vm6 = vmmov 1   ;;  %vm778_vm8 = vcmask 228352   ;;  %vm890_vm9 = vcmask 326656  }
   0xf   : > { %s219_s8 = scalar_lea.vmem %s1482_s0, %s1102_s28  ;;  %287 = vmatpush1.bf16.msra.mxu1 %v1214_v23  ;;  %v712_v60 = vsub.s32 0, %v711_v59  ;;  %v716_v62 = vsub.s32 1, %v711_v59  ;;  %vm1109_vm7 = vmpackc.low %vm785_vm5, %vm1260_vm6  ;;  %s1103_s20 = sshll.u32 %s1489_s19, 4  ;;  %vm972_vm10 = vcmask 687104   ;;  %vm974_vm11 = vcmask 685056  }
  0x10   : > { %v226_v6 = vld [vmem:[%s219_s8] sm:$0xff]  ;;  %v227_v7 = vld [vmem:[%s219_s8 + $0x8] sm:$0xff]  ;;  %v228_v10 = vld [vmem:[%s219_s8 + $0x10] sm:$0xff]  ;;  %s224_s23 = scalar_lea.vmem %s1487_s5, %s1103_s20 }
  0x11   : > { %v1323_v8 = vpack.c.bf16 %v227_v7, %v226_v6  ;;  %v229_v12 = vld [vmem:[%s219_s8 + $0x18] sm:$0xff]  ;;  %v713_v63 = vrot.slane %v708_v61, %v712_v60  ;;  %v717_v1 = vrot.slane %v708_v61, %v716_v62  ;;  %v869_v62 = vld [vmem:[%s1486_s4] sm:$0xff] }
  0x12   : > { %v1337_v14 = vpack.c.bf16 %v229_v12, %v228_v10 }
  0x13   : > { %1054 = vmatmul.mubr.msk.bf16.vlgmr.msra.gmra.mrb[0].mxu0 %vm277_vm0, %v1323_v8  ;;  %v245_v16 = vshll.u32 %v1323_v8, 16  ;;  %v243_v17 = vshrl.u32 %v1323_v8, 16  ;;  %v422_v26 = vrot.slane %v1323_v8, 1  ;;  %v618_v46 = vrot.slane %v1323_v8, 2 }
  0x14   : > { %452 = vmatpush1.bf16.msra.mxu0 %v1194_v9  ;;  %403 = vmatprep.mubr.bf16.mxu0 %v1258_v2  ;;  %v250_v20 = vshll.u32 %v1337_v14, 16  ;;  %v423_v27 = vrot.slane %v1337_v14, 1  ;;  %v254_v32 = vshrl.u32 %v1337_v14, 16  ;;  %v619_v47 = vrot.slane %v1337_v14, 2 }
  0x15   : > { %453 = vmatprep.subr.bf16.mxu0 %v1199_v11  ;;  %v247_v22 = vrot.slane %v245_v16, 1  ;;  %v518_v36 = vrot.slane %v243_v17, 1  ;;  %v519_v37 = vrot.slane %v245_v16, 2 }
  0x16   : > { %v252_v25 = vrot.slane %v250_v20, 1  ;;  %v424_v29 = vsel %vm421_vm2, %v422_v26, %v423_v27  ;;  %v521_v38 = vrot.slane %v254_v32, 1  ;;  %v522_v39 = vrot.slane %v250_v20, 2 }
  0x17   : > { %v248_v24 = vor.u32 %v247_v22, %v243_v17  ;;  %v520_v40 = vor.u32 %v519_v37, %v518_v36  ;;  %v620_v48 = vsel %vm617_vm4, %v618_v46, %v619_v47 }
  0x18   : > { %454 = vmatpush1.bf16.msra.mxu0 %v1197_v13  ;;  %v256_v33 = vor.u32 %v254_v32, %v252_v25  ;;  %v523_v41 = vor.u32 %v522_v39, %v521_v38 }
  0x19   : > { %551 = vmatprep.subr.bf16.mxu0 %v1202_v15  ;;  %v253_v28 = vsel %vm241_vm1, %v248_v24, %v252_v25 }
  0x1a   : > { %1048 = vmatmul.mubr.msk.bf16.vlgmr.msra.gmra.mrb[0].mxu1 %vm277_vm0, %v253_v28  ;;  %v524_v42 = vsel %vm517_vm3, %v520_v40, %v523_v41 }
  0x1b   : > { %1055 = vmatmul.mubr.msk.bf16.gmra.mrb[4].mxu0 %vm277_vm0, %v1337_v14  ;;  %326 = vmatprep.mubr.bf16.mxu1 %v1258_v2 }
  0x1c   : > { %483 = vmatprep.mubr.bf16.mxu0 %v1258_v2 }
  0x22   : > { %1049 = vmatmul.mubr.msk.bf16.gmra.mrb[4].mxu1 %vm277_vm0, %v256_v33 }
  0x23   : > { %1064 = vmatmul.mubr.msk.bf16.vlgmr.msra.gmra.mrb[0].mxu0 %vm277_vm0, %v424_v29  ;;  %856 = vmatprep.mubr.f32.mxu1 %v1259_v49 }
  0x24   : > { %552 = vmatpush1.bf16.msra.mxu0 %v1200_v30  ;;  %493 = vmatprep.mubr.bf16.mxu0 %v1258_v2 }
  0x25   : > { %553 = vmatprep.subr.bf16.mxu0 %v1205_v31 }
  0x28   : > { %554 = vmatpush1.bf16.msra.mxu0 %v1203_v34 }
  0x29   : > { %647 = vmatprep.subr.bf16.mxu0 %v1208_v35 }
  0x2b   : > { %1065 = vmatmul.mubr.msk.bf16.gmra.mrb[4].mxu0 %vm277_vm0, %v423_v27 }
  0x2c   : > { %583 = vmatprep.mubr.bf16.mxu0 %v1258_v2 }
  0x33   : > { %1074 = vmatmul.mubr.msk.bf16.vlgmr.msra.gmra.mrb[0].mxu0 %vm277_vm0, %v524_v42 }
  0x34   : > { %648 = vmatpush1.bf16.msra.mxu0 %v1206_v43  ;;  %593 = vmatprep.mubr.bf16.mxu0 %v1258_v2 }
  0x35   : > { %649 = vmatprep.subr.bf16.mxu0 %v1217_v44 }
  0x38   : > { %650 = vmatpush1.bf16.msra.mxu0 %v1215_v45 }
  0x3b   : > { %1075 = vmatmul.mubr.msk.bf16.gmra.mrb[4].mxu0 %vm277_vm0, %v523_v41 }
  0x3c   : > { %679 = vmatprep.mubr.bf16.mxu0 %v1258_v2 }
  0x43   : > { %1084 = vmatmul.mubr.msk.bf16.vlgmr.msra.gmra.mrb[0].mxu0 %vm277_vm0, %v620_v48 }
  0x44   : > { %689 = vmatprep.mubr.bf16.mxu0 %v1258_v2 }
  0x4b   : > { %1085 = vmatmul.mubr.msk.bf16.gmra.mrb[4].mxu0 %vm277_vm0, %v619_v47 }
  0xed   : > { %v318_v50 = vpop.f32.mrb[0].mxu1 }
  0xee   : > { %v320_v51 = vpop.f32.mrb[1].mxu1 }
  0xef   : > { %v322_v52 = vpop.f32.mrb[2].mxu1 }
  0xf0   : > { %v324_v53 = vpop.f32.mrb[3].mxu1 }
  0xf5   : > { %v328_v54 = vpop.f32.mrb[4].mxu1 }
  0xf6   : > { %v330_v55 = vpop.f32.mrb[5].mxu1 }
  0xf7   : > { %v332_v56 = vpop.f32.mrb[6].mxu1 }
  0xf8   : > { %v334_v57 = vpop.f32.mrb[7].mxu1 }
 0x116   : > { %v681_v0 = vpop.f32.mrb[0].mxu0 }
 0x117   : > { %v1144_v2 = vadd.f32 %v681_v0, %v318_v50  ;;  %v683_v3 = vpop.f32.mrb[1].mxu0  ;;  %v776_v0 = vld [vmem:[%s1485_s3] sm:$0xff] }
 0x118   : > { %v1145_v4 = vadd.f32 %v683_v3, %v320_v51  ;;  %v685_v5 = vpop.f32.mrb[2].mxu0  ;;  %v871_v3 = vld [vmem:[%s1486_s4 + $0x10] sm:$0xff] }
 0x119   : > { %v720_v6 = vadd.f32 %v1144_v2, %v713_v63  ;;  %v1146_v7 = vadd.f32 %v685_v5, %v322_v52  ;;  %v687_v8 = vpop.f32.mrb[3].mxu0  ;;  %v1261_v2 = vmov 0.0|0.0   ;;  %v777_v5 = vld [vmem:[%s1485_s3 + $0x8] sm:$0x3f] }
 0x11a   : > { %v721_v9 = vadd.f32 %v1145_v4, %v717_v1  ;;  %v1147_v10 = vadd.f32 %v687_v8, %v324_v53  ;;  %v872_v4 = vld [vmem:[%s1486_s4 + $0x18] sm:$0xff]  ;;  %v874_v8 = vld [vmem:[%s1486_s4 + $0x28] sm:$0xff] }
 0x11b   : > { %v1086_v11 = vmul.f32 -1.442695, %v720_v6  ;;  %v722_v12 = vadd.f32 %v1146_v7, %v713_v63  ;;  %v1118_v6 = vpack.c.bf16 %v872_v4, %v871_v3  ;;  %v873_v7 = vld [vmem:[%s1486_s4 + $0x20] sm:$0xff] }
 0x11c   : > { %v1087_v13 = vmul.f32 -1.442695, %v721_v9  ;;  %v723_v14 = vadd.f32 %v1147_v10, %v717_v1  ;;  %v1121_v9 = vpack.c.bf16 %v874_v8, %v873_v7  ;;  %v875_v10 = vld [vmem:[%s1486_s4 + $0x30] sm:$0xff] }
 0x11d   : > { %1218 = vpow2.f32 %v1086_v11  ;;  %v1088_v15 = vmul.f32 -1.442695, %v722_v12  ;;  %v876_v11 = vld [vmem:[%s1486_s4 + $0x38] sm:$0xff] }
 0x11e   : > { %1220 = vpow2.f32 %v1087_v13  ;;  %v1089_v16 = vmul.f32 -1.442695, %v723_v14  ;;  %v691_v17 = vpop.f32.mrb[4].mxu0  ;;  %v1124_v12 = vpack.c.bf16 %v876_v11, %v875_v10  ;;  %v877_v13 = vld [vmem:[%s1486_s4 + $0x40] sm:$0xff]  ;;  %v878_v14 = vld [vmem:[%s1486_s4 + $0x48] sm:$0xff] }
 0x11f   : > { %1222 = vpow2.f32 %v1088_v15  ;;  %v1148_v18 = vadd.f32 %v691_v17, %v328_v54  ;;  %v693_v19 = vpop.f32.mrb[5].mxu0  ;;  %v1127_v15 = vpack.c.bf16 %v878_v14, %v877_v13  ;;  %v880_v17 = vld [vmem:[%s1486_s4 + $0x58] sm:$0xff] }
 0x120   : > { %1224 = vpow2.f32 %v1089_v16  ;;  %v1149_v20 = vadd.f32 %v693_v19, %v330_v55  ;;  %v695_v21 = vpop.f32.mrb[6].mxu0  ;;  %v879_v16 = vld [vmem:[%s1486_s4 + $0x50] sm:$0xff]  ;;  %v881_v19 = vld [vmem:[%s1486_s4 + $0x60] sm:$0xff] }
 0x121   : > { %v724_v22 = vadd.f32 %v1148_v18, %v713_v63  ;;  %v1150_v23 = vadd.f32 %v695_v21, %v332_v56  ;;  %v697_v24 = vpop.f32.mrb[7].mxu0  ;;  %v1130_v18 = vpack.c.bf16 %v880_v17, %v879_v16 }
 0x122   : > { %v725_v25 = vadd.f32 %v1149_v20, %v717_v1  ;;  %v1151_v26 = vadd.f32 %v697_v24, %v334_v57  ;;  %v882_v20 = vld [vmem:[%s1486_s4 + $0x68] sm:$0xff] }
 0x123   : > { %v1090_v27 = vmul.f32 -1.442695, %v724_v22  ;;  %v726_v28 = vadd.f32 %v1150_v23, %v713_v63  ;;  %v870_v63 = vld [vmem:[%s1486_s4 + $0x8] sm:$0xff]  ;;  %v1133_v21 = vpack.c.bf16 %v882_v20, %v881_v19  ;;  %v883_v22 = vld [vmem:[%s1486_s4 + $0x70] sm:$0xff]  ;;  %v884_v23 = vld [vmem:[%s1486_s4 + $0x78] sm:$0xff] }
 0x124   : > { %v1091_v29 = vmul.f32 -1.442695, %v725_v25  ;;  %v727_v30 = vadd.f32 %v1151_v26, %v717_v1  ;;  %v1115_v1 = vpack.c.bf16 %v870_v63, %v869_v62  ;;  %v1136_v24 = vpack.c.bf16 %v884_v23, %v883_v22  ;;  %v885_v25 = vld [vmem:[%s1486_s4 + $0x80] sm:$0xff]  ;;  %v886_v26 = vld [vmem:[%s1486_s4 + $0x88] sm:$0xff] }
 0x125   : > { %1226 = vpow2.f32 %v1090_v27  ;;  %v1092_v31 = vmul.f32 -1.442695, %v726_v28  ;;  %v1139_v27 = vpack.c.bf16 %v886_v26, %v885_v25  ;;  %v887_v28 = vld [vmem:[%s1486_s4 + $0x90] sm:$0xff] }
 0x126   : > { %1228 = vpow2.f32 %v1091_v29  ;;  %v1093_v32 = vmul.f32 -1.442695, %v727_v30  ;;  %v888_v29 = vld [vmem:[%s1486_s4 + $0x98] sm:$0xff] }
 0x127   : > { %v1219_v33 = vpop.eup %1218  ;;  %1230 = vpow2.f32 %v1092_v31  ;;  %v1142_v30 = vpack.c.bf16 %v888_v29, %v887_v28  ;;  %v889_v31 = vld [vmem:[%s1486_s4 + $0xa0] sm:$0xff] }
 0x128   : > { %v1221_v34 = vpop.eup %1220  ;;  %v752_v35 = vadd.f32 1.0, %v1219_v33  ;;  %1232 = vpow2.f32 %v1093_v32 }
 0x129   : > { %v1223_v36 = vpop.eup %1222  ;;  %v753_v37 = vadd.f32 1.0, %v1221_v34 }
 0x12a   : > { %v1225_v38 = vpop.eup %1224  ;;  %1234 = vrcp.f32 %v752_v35  ;;  %v754_v39 = vadd.f32 1.0, %v1223_v36 }
 0x12b   : > { %1236 = vrcp.f32 %v753_v37  ;;  %v755_v40 = vadd.f32 1.0, %v1225_v38 }
 0x12c   : > { %1238 = vrcp.f32 %v754_v39 }
 0x12d   : > { %1240 = vrcp.f32 %v755_v40 }
 0x12f   : > { %v1227_v41 = vpop.eup %1226 }
 0x130   : > { %v1229_v42 = vpop.eup %1228  ;;  %v756_v43 = vadd.f32 1.0, %v1227_v41 }
 0x131   : > { %v1231_v44 = vpop.eup %1230  ;;  %v757_v45 = vadd.f32 1.0, %v1229_v42 }
 0x132   : > { %v1233_v46 = vpop.eup %1232  ;;  %1242 = vrcp.f32 %v756_v43  ;;  %v758_v47 = vadd.f32 1.0, %v1231_v44 }
 0x133   : > { %1244 = vrcp.f32 %v757_v45  ;;  %v759_v48 = vadd.f32 1.0, %v1233_v46 }
 0x134   : > { %v1235_v50 = vpop.eup %1234  ;;  %1246 = vrcp.f32 %v758_v47 }
 0x135   : > { %v1237_v51 = vpop.eup %1236  ;;  %1248 = vrcp.f32 %v759_v48 }
 0x136   : > { %v1239_v52 = vpop.eup %1238 }
 0x137   : > { %v1241_v53 = vpop.eup %1240  ;;  %v1106_v54 = vpack.c.bf16 %v1239_v52, %v1235_v50 }
 0x138   : > { %v1104_v55 = vpack.c.bf16 %v1241_v53, %v1237_v51 }
 0x13a   : > { %1105 = vmatprep.subr.bf16.mxu1 %v1104_v55 }
 0x13b   : > { %1107 = vmatpush1.bf16.msra.mxu1 %v1106_v54 }
 0x13c   : > { %v1243_v56 = vpop.eup %1242 }
 0x13d   : > { %v1245_v57 = vpop.eup %1244 }
 0x13e   : > { %v1247_v58 = vpop.eup %1246 }
 0x13f   : > { %v1249_v59 = vpop.eup %1248  ;;  %v1111_v60 = vpack.c.bf16 %v1247_v58, %v1243_v56 }
 0x140   : > { %v1108_v61 = vpack.c.bf16 %v1249_v59, %v1245_v57 }
 0x142   : > { %1110 = vmatprep.subr.msk.bf16.mxu1 %vm1109_vm7, %v1108_v61 }
 0x143   : > { %1113 = vmatpush1.bf16.msk.msra.mxu1 %vm1109_vm7, %v1111_v60 }
 0x144   : > { %1114 = vmatprep.subr.bf16.mxu1 %v1261_v2 }
 0x146   : > { %1096 = vmatmul.mubr.msk.f32.vlgmr.msra.gmra.mrb[8].mxu1 %vm778_vm8, %v776_v0 }
 0x147   : > { %862 = vmatprep.mubr.f32.mxu1 %v1259_v49  ;;  %1116 = vmatpush1.bf16.msra.mxu1 %v1115_v1 }
 0x148   : > { %1117 = vmatprep.subr.bf16.mxu1 %v1261_v2 }
 0x14a   : > { %1097 = vmatmul.mubr.msk.f32.gmra.mrb[10].mxu1 %vm778_vm8, %v777_v5 }
 0x14b   : > { %1119 = vmatpush1.bf16.msra.mxu1 %v1118_v6 }
 0x14c   : > { %1120 = vmatprep.subr.bf16.mxu1 %v1261_v2 }
 0x14f   : > { %1122 = vmatpush1.bf16.msra.mxu1 %v1121_v9 }
 0x150   : > { %1123 = vmatprep.subr.bf16.mxu1 %v1261_v2 }
 0x153   : > { %1125 = vmatpush1.bf16.msra.mxu1 %v1124_v12 }
 0x154   : > { %1126 = vmatprep.subr.bf16.mxu1 %v1261_v2 }
 0x157   : > { %1128 = vmatpush1.bf16.msra.mxu1 %v1127_v15 }
 0x158   : > { %1129 = vmatprep.subr.bf16.mxu1 %v1261_v2 }
 0x15b   : > { %1131 = vmatpush1.bf16.msra.mxu1 %v1130_v18 }
 0x15c   : > { %1132 = vmatprep.subr.bf16.mxu1 %v1261_v2 }
 0x15f   : > { %1134 = vmatpush1.bf16.msra.mxu1 %v1133_v21 }
 0x160   : > { %1135 = vmatprep.subr.bf16.mxu1 %v1261_v2 }
 0x163   : > { %1137 = vmatpush1.bf16.msra.mxu1 %v1136_v24 }
 0x164   : > { %1138 = vmatprep.subr.bf16.mxu1 %v1261_v2 }
 0x167   : > { %1140 = vmatpush1.bf16.msra.mxu1 %v1139_v27 }
 0x168   : > { %1141 = vmatprep.subr.bf16.mxu1 %v1261_v2 }
 0x16b   : > { %1143 = vmatpush1.bf16.msra.mxu1 %v1142_v30 }
 0x16c   : > { %937 = vmatprep.subr.mxu1 %v1259_v49 }
 0x16f   : > { %938 = vmatpush1.msra.mxu1 %v889_v31 }
 0x219   : > { %v858_v32 = vpop.f32.mrb[8].mxu1 }
 0x21a   : > { %v860_v33 = vpop.f32.mrb[9].mxu1 }
 0x21b   : > { %1098 = vmatprep.mubr.msk.f32.mxu1 %vm890_vm9, %v860_v33 }
 0x21c   : > { %962 = vmatmul.mubr.f32.vlgmr.msra.gmra.mrb[12].mxu1 %v858_v32 }
 0x21d   : > { %v864_v34 = vpop.f32.mrb[10].mxu1 }
 0x21e   : > { %v866_v35 = vpop.f32.mrb[11].mxu1 }
 0x21f   : > { %1099 = vmatprep.mubr.msk.f32.mxu1 %vm890_vm9, %v866_v35 }
 0x220   : > { %967 = vmatmul.mubr.f32.gmra.mrb[14].mxu1 %v864_v34 }
 0x2ef   : > { %v963_v49 = vpop.f32.mrb[12].mxu1 }
 0x2f0   : > { %973 = vst.msk [vmem:[%s224_s23] sm:$0xff] %vm972_vm10, %v963_v49  ;;  %v965_v36 = vpop.f32.mrb[13].mxu1 }
 0x2f3   : > { %v968_v37 = vpop.f32.mrb[14].mxu1 }
 0x2f4   : > { %975 = vst.msk [vmem:[%s224_s23 + $0x8] sm:$0x3f] %vm974_vm11, %v968_v37  ;;  %v970_v38 = vpop.f32.mrb[15].mxu1 }
 0x2f5 PF: > { %s15_s18 = sadd.s32 1, %s1256_s18  }
 0x2f6   : > { %p12_p4 = scmp.ge.s32.totalorder %s15_s18, 4  }
 0x2f8   :  { %14 = sbr.rel (!%p12_p4) target bundleno = 1 (0x1), region = 74 }

// kernel: lenet_forward.5
= control target key start
LH: loop header
LB: loop body
LE: loop exit
PB: predicated region body
PF: predicated region fallthrough
CT: control target
= control target key end

     0   :  { %v788_v1 = vmov 0   ;;  %v34_v18 = vlaneseq  ;;  %v789_v27 = vmov 1983009808   ;;  %vm262_vm0 = vcmask 130048   ;;  %s999_s0 = inlined_call_operand.vmem [shape: f32[2,400], index: 0, kind: input, shape index: {}]   ;;  %s1000_s1 = inlined_call_operand.vmem [shape: bf16[400,120], index: 1, kind: input, shape index: {}]   ;;  %s1001_s2 = inlined_call_operand.vmem [shape: f32[1,120], index: 2, kind: input, shape index: {}]   ;;  %s1002_s3 = inlined_call_operand.vmem [shape: bf16[120,84], index: 3, kind: input, shape index: {}]   ;;  %s1003_s4 = inlined_call_operand.vmem [shape: f32[1,84], index: 4, kind: input, shape index: {}]   ;;  %s1004_s5 = inlined_call_operand.vmem [shape: bf16[84,10], index: 5, kind: input, shape index: {}]   ;;  %s1005_s6 = inlined_call_operand.vmem [shape: f32[1,10], index: 6, kind: input, shape index: {}]   ;;  %s1006_s7 = inlined_call_operand.hbm [shape: f32[2,10], index: 7, kind: output, shape index: {}]  }
   0x1   :  { %v716_v0 = vld [vmem:[%s1000_s1 + $0x40] sm:$0xff]   ;;  %306 = vmatprep.subr.bf16.mxu1 %v788_v1  ;;  %v719_v4 = vld [vmem:[%s1000_s1 + $0x48] sm:$0xff]   ;;  %v722_v7 = vld [vmem:[%s1000_s1 + $0x50] sm:$0xff]   ;;  %v32_v28 = vunpack.c.l.s4 %v789_v27 }
   0x2   :  { %v717_v2 = vld [vmem:[%s1000_s1 + $0x80] sm:$0xff]   ;;  %637 = vmatprep.subr.bf16.mxu0 %v716_v0  ;;  %v720_v5 = vld [vmem:[%s1000_s1 + $0x88] sm:$0xff]   ;;  %v723_v8 = vld [vmem:[%s1000_s1 + $0x90] sm:$0xff]   ;;  %v35_v23 = vshrl.u32 %v34_v18, 7 }
   0x3   :  { %v718_v3 = vld [vmem:[%s1000_s1] sm:$0xff]   ;;  %307 = vmatpush1.bf16.msra.mxu1 %v717_v2  ;;  %v721_v6 = vld [vmem:[%s1000_s1 + $0x8] sm:$0xff]   ;;  %v724_v9 = vld [vmem:[%s1000_s1 + $0x10] sm:$0xff]   ;;  %v33_v31 = vunpack.c.0.s8 %v32_v28 }
   0x4   :  { %638 = vmatpush3.bf16.msra.mxu0 %v718_v3  ;;  %308 = vmatprep.subr.bf16.mxu1 %v788_v1  ;;  %v725_v10 = vld [vmem:[%s1000_s1 + $0x58] sm:$0xff]   ;;  %v728_v13 = vld [vmem:[%s1000_s1 + $0x60] sm:$0xff]   ;;  %v731_v16 = vld [vmem:[%s1000_s1 + $0x68] sm:$0xff]  }
   0x5   :  { %639 = vmatprep.subr.bf16.mxu0 %v719_v4  ;;  %v726_v11 = vld [vmem:[%s1000_s1 + $0x98] sm:$0xff]   ;;  %v729_v14 = vld [vmem:[%s1000_s1 + $0xa0] sm:$0xff]   ;;  %v732_v17 = vld [vmem:[%s1000_s1 + $0xa8] sm:$0xff]   ;;  %v36_v32 = vsub.s32 %v33_v31, %v35_v23 }
   0x6   :  { %v727_v12 = vld [vmem:[%s1000_s1 + $0x18] sm:$0xff]   ;;  %v730_v15 = vld [vmem:[%s1000_s1 + $0x20] sm:$0xff]   ;;  %v733_v19 = vld [vmem:[%s1000_s1 + $0x28] sm:$0xff]  }
   0x7   :  { %309 = vmatpush1.bf16.msra.mxu1 %v720_v5  ;;  %v734_v20 = vld [vmem:[%s1000_s1 + $0x70] sm:$0xff]   ;;  %v737_v24 = vld [vmem:[%s1000_s1 + $0x78] sm:$0xff]   ;;  %v28_v25 = vld [vmem:[%s999_s0] sm:$0xff] }
   0x8   :  { %640 = vmatpush3.bf16.msra.mxu0 %v721_v6  ;;  %310 = vmatprep.subr.bf16.mxu1 %v788_v1  ;;  %v735_v21 = vld [vmem:[%s1000_s1 + $0xb0] sm:$0xff]   ;;  %v738_v26 = vld [vmem:[%s1000_s1 + $0xb8] sm:$0xff]   ;;  %v30_v30 = vcombine.high %v28_v25, %v28_v25  ;;  %v741_v33 = vld [vmem:[%s1000_s1 + $0xc0] sm:$0xff]   ;;  %v37_v34 = vrot.slane %v28_v25, %v36_v32 }
   0x9   :  { %641 = vmatprep.subr.bf16.mxu0 %v722_v7  ;;  %v736_v22 = vld [vmem:[%s1000_s1 + $0x30] sm:$0xff]   ;;  %v739_v29 = vld [vmem:[%s1000_s1 + $0x38] sm:$0xff]  }
   0xa   :  { %v44_v35 = vrot.slane %v30_v30, %v36_v32  ;;  %v45_v36 = vcombine.high %v37_v34, %v37_v34  ;;  %v51_v38 = vpack.c.bf16 %v37_v34, %v37_v34 }
   0xb   :  { %311 = vmatpush1.bf16.msra.mxu1 %v723_v8 }
   0xc   :  { %642 = vmatpush3.bf16.msra.mxu0 %v724_v9  ;;  %312 = vmatprep.subr.bf16.mxu1 %v788_v1  ;;  %v46_v37 = vcombine.high %v44_v35, %v44_v35  ;;  %v53_v39 = vpack.c.bf16 %v44_v35, %v44_v35 }
   0xd   :  { %643 = vmatprep.subr.bf16.mxu0 %v725_v10 }
   0xf   :  { %313 = vmatpush1.bf16.msra.mxu1 %v726_v11 }
  0x10   :  { %644 = vmatpush3.bf16.msra.mxu0 %v727_v12  ;;  %314 = vmatprep.subr.bf16.mxu1 %v788_v1 }
  0x11   :  { %645 = vmatprep.subr.bf16.mxu0 %v728_v13 }
  0x13   :  { %315 = vmatpush1.bf16.msra.mxu1 %v729_v14 }
  0x14   :  { %646 = vmatpush3.bf16.msra.mxu0 %v730_v15  ;;  %316 = vmatprep.subr.bf16.mxu1 %v788_v1 }
  0x15   :  { %647 = vmatprep.subr.bf16.mxu0 %v731_v16 }
  0x17   :  { %317 = vmatpush1.bf16.msra.mxu1 %v732_v17 }
  0x18   :  { %648 = vmatpush3.bf16.msra.mxu0 %v733_v19  ;;  %318 = vmatprep.subr.bf16.mxu1 %v788_v1 }
  0x19   :  { %649 = vmatprep.subr.bf16.mxu0 %v734_v20 }
  0x1b   :  { %319 = vmatpush1.bf16.msra.mxu1 %v735_v21 }
  0x1c   :  { %650 = vmatpush3.bf16.msra.mxu0 %v736_v22  ;;  %320 = vmatprep.subr.bf16.mxu1 %v788_v1 }
  0x1d   :  { %651 = vmatprep.subr.bf16.mxu0 %v737_v24 }
  0x1f   :  { %321 = vmatpush1.bf16.msra.mxu1 %v738_v26 }
  0x20   :  { %652 = vmatpush3.bf16.msra.mxu0 %v739_v29  ;;  %322 = vmatprep.subr.bf16.mxu1 %v788_v1 }
  0x21   :  { %12 = vsyncpa [#allocation3], 0  ;;  %v52_v40 = vpack.c.bf16 %v45_v36, %v45_v36  ;;  %v54_v41 = vpack.c.bf16 %v46_v37, %v46_v37  ;;  %v742_v42 = vld [vmem:[%s1002_s3] sm:$0xff]   ;;  %v790_v43 = vmov 0.0   ;;  %v743_v44 = vld [vmem:[%s1002_s3 + $0x8] sm:$0xff]   ;;  %vm424_vm1 = vcmask 1043456  }
  0x22   :  { %675 = vmatprep.subr.bf16.mxu0 %v790_v43  ;;  %v744_v45 = vld [vmem:[%s1002_s3 + $0x10] sm:$0xff]   ;;  %v745_v46 = vld [vmem:[%s1002_s3 + $0x18] sm:$0xff]   ;;  %v746_v47 = vld [vmem:[%s1002_s3 + $0x20] sm:$0xff]   ;;  %vm791_vm2 = vmmov 0   ;;  %vm420_vm3 = vcmask 982016   ;;  %vm530_vm4 = vcmask 1041408  }
  0x23   :  { %323 = vmatpush1.bf16.msra.mxu1 %v741_v33  ;;  %298 = vmatprep.mubr.bf16.mxu0 %v52_v40  ;;  %v747_v48 = vld [vmem:[%s1002_s3 + $0x28] sm:$0xff]   ;;  %v748_v49 = vld [vmem:[%s1002_s3 + $0x30] sm:$0xff]   ;;  %v749_v50 = vld [vmem:[%s1002_s3 + $0x38] ss:$0 sps:$4 sm:$0xff]   ;;  %vm526_vm5 = vcmask 687104   ;;  %s792_s11 = smov [#allocation2]  }
  0x24   :  { %616 = vmatprep.mubr.msk.bf16.mxu1 %vm262_vm0, %v54_v41  ;;  %299 = vmatmul.mubr.bf16.vlgmr.msra.gmra.mrb[0].mxu0 %v51_v38  ;;  %v426_v51 = vsel %vm424_vm1, %v749_v50, 0  ;;  %v590_v55 = vld [vmem:[%s1001_s2] ss:$0 sm:$0xff]  ;;  %v751_v6 = vld [vmem:[%s1004_s5 + $0x8] sm:$0xff]   ;;  %v752_v7 = vld [vmem:[%s1004_s5 + $0x10] sm:$0xff]   ;;  %vm574_vm6 = vcmask 74752  }
  0x25   :  { %695 = vmatprep.subr.bf16.mxu1 %v790_v43  ;;  %676 = vmatpush3.bf16.msra.mxu0 %v742_v42  ;;  %v750_v5 = vld [vmem:[%s1004_s5] sm:$0xff]   ;;  %v753_v8 = vld [vmem:[%s1004_s5 + $0x18] sm:$0xff]   ;;  %v755_v10 = vld [vmem:[%s1004_s5 + $0x28] ss:$0 sps:$4 sm:$0x33]  }
  0x26   :  { %339 = vmatmul.mubr.bf16.vlgmr.msra.gmra.mrb[0].mxu1 %v53_v39  ;;  %677 = vmatprep.subr.bf16.mxu0 %v790_v43  ;;  %v754_v9 = vld [vmem:[%s1004_s5 + $0x20] sm:$0xff]   ;;  %v532_v11 = vsel %vm530_vm4, %v755_v10, 0 }
  0x27   :  { %691 = vmatprep.mubr.msk.bf16.mxu0 %vm791_vm2, %v790_v43  ;;  %707 = vmatprep.mubr.msk.bf16.mxu1 %vm791_vm2, %v790_v43  ;;  %v618_v12 = vld [vmem:[%s1003_s4] ss:$0 sm:$0xff]  ;;  %s582_s4 = sshll.u32 %s792_s11, 4  ;;  %s583_s4 = int_to_ptr.vmem [resolvable:$true] %s582_s4 }
  0x28   :  { %696 = vmatpush3.bf16.msra.mxu1 %v750_v5  ;;  %v629_v23 = vld [vmem:[%s1005_s6] ss:$0 sm:$0xff]  ;;  %s764_s12 = scalar_lea.vmem %s583_s4, 32  ;;  %p769_p1 = scmp.lt.s32.totalorder %s583_s4, %s583_s4 }
  0x29   :  { %678 = vmatpush3.bf16.msra.mxu0 %v743_v44  ;;  %697 = vmatprep.subr.bf16.mxu1 %v790_v43  ;;  %p765_p0 = scmp.ne.s32.totalorder %s583_s4, %s764_s12  ;;  %p770_p2 = scmp.lt.s32.totalorder %s764_s12, %s764_s12 }
  0x2a   :  { %679 = vmatprep.subr.bf16.mxu0 %v790_v43 }
  0x2b   :  { %p771_p3 = por %p770_p2, %p769_p1 }
  0x2c   :  { %698 = vmatpush3.bf16.msra.mxu1 %v751_v6 }
  0x2d   :  { %680 = vmatpush3.bf16.msra.mxu0 %v744_v45  ;;  %699 = vmatprep.subr.bf16.mxu1 %v790_v43  ;;  %p772_p4 = pnand %p771_p3, %p765_p0 }
  0x2e   :  { %681 = vmatprep.subr.bf16.mxu0 %v790_v43 }
  0x30   :  { %700 = vmatpush3.bf16.msra.mxu1 %v752_v7 }
  0x31   :  { %682 = vmatpush3.bf16.msra.mxu0 %v745_v46  ;;  %701 = vmatprep.subr.bf16.mxu1 %v790_v43 }
  0x32   :  { %683 = vmatprep.subr.bf16.mxu0 %v790_v43 }
  0x34   :  { %702 = vmatpush3.bf16.msra.mxu1 %v753_v8 }
  0x35   :  { %684 = vmatpush3.bf16.msra.mxu0 %v746_v47  ;;  %703 = vmatprep.subr.bf16.mxu1 %v790_v43 }
  0x36   :  { %685 = vmatprep.subr.bf16.mxu0 %v790_v43 }
  0x38   :  { %704 = vmatpush3.bf16.msra.mxu1 %v754_v9 }
  0x39   :  { %686 = vmatpush3.bf16.msra.mxu0 %v747_v48  ;;  %705 = vmatprep.subr.bf16.mxu1 %v790_v43 }
  0x3a   :  { %687 = vmatprep.subr.bf16.mxu0 %v790_v43 }
  0x3c   :  { %706 = vmatpush3.bf16.msra.mxu1 %v532_v11 }
  0x3d   :  { %688 = vmatpush3.bf16.msra.mxu0 %v748_v49 }
  0x3e   :  { %689 = vmatprep.subr.bf16.mxu0 %v790_v43 }
  0x41   :  { %690 = vmatpush3.bf16.msra.mxu0 %v426_v51 }
  0xf7   :  { %v653_v52 = vpop.f32.mrb[0].mxu0 }
  0xf8   :  { %v654_v54 = vpop.f32.mrb[1].mxu0 }
  0xf9   :  { %v340_v53 = vpop.f32.mrb[0].mxu1  ;;  %v655_v57 = vadd.f32 %v654_v54, %v653_v52  ;;  %v656_v58 = vpop.f32.mrb[2].mxu0 }
  0xfa   :  { %v342_v56 = vpop.f32.mrb[1].mxu1  ;;  %v657_v60 = vpop.f32.mrb[3].mxu0 }
  0xfb   :  { %v343_v59 = vpop.f32.mrb[2].mxu1  ;;  %v301_v62 = vadd.f32 %v655_v57, %v590_v55 }
  0xfc   :  { %v344_v61 = vpop.f32.mrb[3].mxu1 }
  0xfd   :  { %v341_v63 = vadd.f32 %v340_v53, %v301_v62 }
  0xff   :  { %v617_v0 = vmul.f32 -1.442695, %v341_v63 }
 0x101   :  { %756 = vpow2.f32 %v617_v0 }
 0x10b   :  { %v757_v1 = vpop.eup %756 }
 0x10c   :  { %v349_v2 = vadd.f32 1.0, %v757_v1 }
 0x10e   :  { %758 = vrcp.f32 %v349_v2 }
 0x118   :  { %v759_v3 = vpop.eup %758 }
 0x119   :  { %v352_v4 = vpack.c.bf16 %v759_v3, %v759_v3 }
 0x11b   :  { %692 = vmatmul.mubr.msk.bf16.vlgmr.msra.gmra.mrb[4].mxu0 %vm420_vm3, %v352_v4 }
 0x1ee   :  { %v462_v13 = vpop.f32.mrb[4].mxu0 }
 0x1ef   :  { %v463_v14 = vadd.f32 %v618_v12, %v462_v13  ;;  %v693_v15 = vpop.f32.mrb[5].mxu0 }
 0x1f0   :  { %v465_v16 = vpop.f32.mrb[6].mxu0 }
 0x1f1   :  { %v628_v17 = vmul.f32 -1.442695, %v463_v14  ;;  %v694_v18 = vpop.f32.mrb[7].mxu0 }
 0x1f3   :  { %760 = vpow2.f32 %v628_v17 }
 0x1fd   :  { %v761_v19 = vpop.eup %760 }
 0x1fe   :  { %v471_v20 = vadd.f32 1.0, %v761_v19 }
 0x200   :  { %762 = vrcp.f32 %v471_v20 }
 0x20a   :  { %v763_v21 = vpop.eup %762 }
 0x20b   :  { %v474_v22 = vpack.c.bf16 %v763_v21, %v763_v21 }
 0x20d   :  { %708 = vmatmul.mubr.msk.bf16.vlgmr.msra.gmra.mrb[4].mxu1 %vm526_vm5, %v474_v22 }
 0x2e0   :  { %v568_v24 = vpop.f32.mrb[4].mxu1 }
 0x2e1   :  { %v569_v25 = vadd.f32 %v629_v23, %v568_v24  ;;  %v709_v26 = vpop.f32.mrb[5].mxu1 }
 0x2e2   :  { %v571_v27 = vpop.f32.mrb[6].mxu1 }
 0x2e3   :  { %v710_v28 = vpop.f32.mrb[7].mxu1  ;;  %575 = vst.msk [vmem:[#allocation2] sm:$0x3] %vm574_vm6, %v569_v25 }
 0x2e4   :  { %775 = shalt.err (!%p772_p4)
}
 0x2e5   :  { %s776_s6 = scalar_lea.hbm %s1006_s7, 32 }
 0x2e6   :  { %p777_p5 = scmp.ne.s32.totalorder %s1006_s7, %s776_s6  ;;  %p780_p6 = scmp.lt.u32.totalorder %s776_s6, %s1006_s7 }
 0x2e8   :  { %p782_p7 = pnand %p780_p6, %p777_p5 }
 0x2ea   :  { %785 = shalt.err (!%p782_p7)
}
 0x2eb   :  { %585 = dma.vmem_to_hbm [thread:$0]  %s583_s4, 32, %s1006_s7, [#allocation3]  }
 0x2ec   :  { %786 = dma.done.wait [#allocation3], 32  }
 0x2ed   :  { %787 = vsyncadd [#allocation3], 4294967264 }
 0x2ee   :  { %589 = vsyncpa [#allocation3], 1 }

</bundles_post_ra>
